<compile_context>
chip_gen: v5e
topology: v5e:2x2
jax: 0.10.0
libtpu: 0.0.40
codegen_flags: <defaults>
</compile_context>

<pallas_src>
import functools

import jax
import jax.numpy as jnp
from jax.experimental import pallas as pl
from jax.experimental.pallas import tpu as pltpu

_DILATIONS = (1, 2, 3, 1)          # conv1..conv4 of ResPath1
_UNIQUE_DILATIONS = (1, 2, 3)      # deduplicated mask blocks


def _respath1_kernel(x_ref, w_ref, b_ref, m_ref, o_ref, *, Cp, W, n_lanes):
    """Fused ResPath1 forward, whole batch folded into the lane axis.

    x_ref : (Cp, n_lanes)   input; channels (padded to Cp) on sublanes,
                            lane index = n*H*W + y*W + x (batch folded).
    w_ref : (4*Cp, 9*Cp)    BN-scale-folded conv weights, one block per conv.
    b_ref : (4*Cp, 1)       folded BN bias.
    m_ref : (3*9, n_lanes)  per-tap in-image masks (one 9-row block per unique
                            dilation, tiled per image along lanes).
    o_ref : (Cp, n_lanes)   output (residual already added).
    """
    xin = x_ref[...]
    cur = xin
    for i, d in enumerate(_DILATIONS):
        mi = _UNIQUE_DILATIONS.index(d) * 9
        slabs = []
        for t in range(9):
            ky, kx = t // 3, t % 3
            s = (ky - 1) * d * W + (kx - 1) * d     # flat lane shift of tap t
            if s == 0:
                slabs.append(cur)                   # center tap: always valid
            else:
                # dest[q] = cur[(q + s) mod n_lanes]; every lane where the
                # roll wraps (image border / adjacent image) is masked to 0.
                rolled = pltpu.roll(cur, shift=(-s) % n_lanes, axis=1)
                slabs.append(rolled * m_ref[mi + t:mi + t + 1, :])
        im = jnp.concatenate(slabs, axis=0)                     # (9*Cp, n_lanes)
        w = w_ref[i * Cp:(i + 1) * Cp, :]                       # (Cp, 9*Cp)
        b = b_ref[i * Cp:(i + 1) * Cp, :]                       # (Cp, 1)
        y = jnp.dot(w, im, preferred_element_type=jnp.float32)  # one MXU matmul
        cur = jnp.maximum(y + b, 0.0)                           # BN bias + ReLU
    o_ref[...] = cur + xin                                      # residual add


def _fold_bn(gamma, beta, mean, var, eps=1e-5):
    """Fold inference BatchNorm into per-channel scale/bias."""
    scale = gamma / jnp.sqrt(var + eps)
    bias = beta - mean * scale
    return scale.astype(jnp.float32), bias.astype(jnp.float32)


def _tap_masks(H, W, N, dilations):
    """0/1 rows, one per (dilation, tap), marking taps that stay in-image."""
    yy = jnp.arange(H, dtype=jnp.int32)[:, None]
    xx = jnp.arange(W, dtype=jnp.int32)[None, :]
    rows = []
    for d in dilations:
        for ky in range(3):
            for kx in range(3):
                dy, dx = (ky - 1) * d, (kx - 1) * d
                ok = ((yy + dy >= 0) & (yy + dy < H) &
                      (xx + dx >= 0) & (xx + dx < W))
                rows.append(jnp.tile(ok.astype(jnp.float32).reshape(H * W), N))
    return jnp.stack(rows, axis=0)              # (len(dilations)*9, N*H*W)


def respath1_forward(x_nchw, params):
    """ResPath1.forward. x_nchw: (N,C,H,W) f32 -> (N,C,H,W) f32."""
    N, C, H, W = x_nchw.shape
    HW = H * W
    n_lanes = N * HW
    n_conv = len(_DILATIONS)
    Cp = -(-C // 8) * 8                         # pad channels to sublane tile

    # Pack per-conv weights (BN scale folded) and biases, channel-padded:
    #   w_all[i*Cp + co, t*Cp + ci] = w_i[co, ci, ky, kx] * bn_scale_i[co]
    w_rows, b_rows = [], []
    for i in range(n_conv):
        scale, bias = _fold_bn(params[f"g{i + 1}"], params[f"b{i + 1}"],
                               params[f"m{i + 1}"], params[f"v{i + 1}"])
        w = params[f"w{i + 1}"].astype(jnp.float32)             # (C,C,3,3) OIHW
        wt = jnp.transpose(w, (0, 2, 3, 1)).reshape(C, 9, C)    # (co, t, ci)
        wt = jnp.pad(wt, ((0, Cp - C), (0, 0), (0, Cp - C)))    # zero-pad chans
        scale_p = jnp.pad(scale, (0, Cp - C))
        bias_p = jnp.pad(bias, (0, Cp - C))
        w_rows.append(wt.reshape(Cp, 9 * Cp) * scale_p[:, None])
        b_rows.append(bias_p[:, None])
    w_all = jnp.concatenate(w_rows, axis=0)     # (n_conv*Cp, 9*Cp)
    b_all = jnp.concatenate(b_rows, axis=0)     # (n_conv*Cp, 1)
    masks = _tap_masks(H, W, N, _UNIQUE_DILATIONS)   # (27, n_lanes)

    # Channels -> sublanes, batch folded into lanes: (Cp, N*H*W), lane-dense.
    x_c = jnp.transpose(x_nchw, (1, 0, 2, 3)).reshape(C, n_lanes)
    x_cp = jnp.pad(x_c.astype(jnp.float32), ((0, Cp - C), (0, 0)))

    kernel = functools.partial(_respath1_kernel, Cp=Cp, W=W, n_lanes=n_lanes)

    out2d = pl.pallas_call(
        kernel,
        out_shape=jax.ShapeDtypeStruct((Cp, n_lanes), jnp.float32),
        grid=(1,),
        in_specs=[
            pl.BlockSpec((Cp, n_lanes), lambda i: (0, 0)),
            pl.BlockSpec((n_conv * Cp, 9 * Cp), lambda i: (0, 0)),
            pl.BlockSpec((n_conv * Cp, 1), lambda i: (0, 0)),
            pl.BlockSpec((len(_UNIQUE_DILATIONS) * 9, n_lanes),
                         lambda i: (0, 0)),
        ],
        out_specs=pl.BlockSpec((Cp, n_lanes), lambda i: (0, 0)),
        compiler_params=pltpu.CompilerParams(
            dimension_semantics=("arbitrary",)),
    )(x_cp, w_all, b_all, masks)

    # Drop padded channels, un-fold batch: (Cp,N*HW) -> (N,C,H,W).
    return out2d[:C].reshape(C, N, H, W).transpose(1, 0, 2, 3)


def respath1_reference(x_nchw, params):
    """Pure-JAX reference (lax.conv_general_dilated) for validation."""
    x = x_nchw.astype(jnp.float32)
    cur = x
    for i, d in enumerate(_DILATIONS):
        w = params[f"w{i + 1}"].astype(jnp.float32)
        y = jax.lax.conv_general_dilated(
            cur, w, window_strides=(1, 1),
            padding=((d, d), (d, d)), rhs_dilation=(d, d),
            dimension_numbers=("NCHW", "OIHW", "NCHW"))
        scale, bias = _fold_bn(params[f"g{i + 1}"], params[f"b{i + 1}"],
                               params[f"m{i + 1}"], params[f"v{i + 1}"])
        cur = jnp.maximum(y * scale[None, :, None, None]
                          + bias[None, :, None, None], 0.0)
    return x + cur


if __name__ == "__main__":
    N, C, H, W = 2, 4, 16, 16
    key = jax.random.PRNGKey(0)
    ks = jax.random.split(key, 1 + 5 * 4)

    x = jax.random.normal(ks[0], (N, C, H, W), dtype=jnp.float32)

    # Deterministic synthetic parameters (Conv2d OIHW weights, bias=False;
    # BatchNorm2d gamma/beta + running stats) for the 4 conv blocks.
    params = {}
    k = 1
    for i in range(1, 5):
        params[f"w{i}"] = 0.1 * jax.random.normal(ks[k], (C, C, 3, 3),
                                                  dtype=jnp.float32); k += 1
        params[f"g{i}"] = 1.0 + 0.1 * jax.random.normal(ks[k], (C,),
                                                        dtype=jnp.float32); k += 1
        params[f"b{i}"] = 0.1 * jax.random.normal(ks[k], (C,),
                                                  dtype=jnp.float32); k += 1
        params[f"m{i}"] = 0.05 * jax.random.normal(ks[k], (C,),
                                                   dtype=jnp.float32); k += 1
        params[f"v{i}"] = jax.random.uniform(ks[k], (C,), minval=0.5,
                                             maxval=1.5,
                                             dtype=jnp.float32); k += 1

    out = jax.jit(respath1_forward)(x, params)
    out = jax.block_until_ready(out)

    ref = respath1_reference(x, params)
    assert out.shape == (N, C, H, W)
    assert jnp.allclose(out, ref, atol=1e-4, rtol=1e-4), \
        f"max abs err = {jnp.max(jnp.abs(out - ref))}"

    print("KERNEL_OK")
</pallas_src>

<mosaic_0001>
module attributes {stable_mosaic.version = 11 : i64} {
  func.func @_respath1_kernel(%arg0: i32, %arg1: memref<8x512xf32, #tpu.memory_space<vmem>>, %arg2: memref<32x72xf32, #tpu.memory_space<vmem>>, %arg3: memref<32x1xf32, #tpu.memory_space<vmem>>, %arg4: memref<27x512xf32, #tpu.memory_space<vmem>>, %arg5: memref<8x512xf32, #tpu.memory_space<vmem>>) attributes {dimension_semantics = [#tpu.dimension_semantics<arbitrary>], iteration_bounds = array<i64: 1>, scalar_prefetch = 0 : i64, scratch_operands = 0 : i64, tpu.core_type = #tpu.core_type<tc>, window_params = [{pipeline_mode = #tpu.pipeline_mode<synchronous>, transform_indices = @transform_0, window_bounds = array<i64: 8, 512>}, {pipeline_mode = #tpu.pipeline_mode<synchronous>, transform_indices = @transform_1, window_bounds = array<i64: 32, 72>}, {pipeline_mode = #tpu.pipeline_mode<synchronous>, transform_indices = @transform_2, window_bounds = array<i64: 32, 1>}, {pipeline_mode = #tpu.pipeline_mode<synchronous>, transform_indices = @transform_3, window_bounds = array<i64: 27, 512>}, {pipeline_mode = #tpu.pipeline_mode<synchronous>, transform_indices = @transform_4, window_bounds = array<i64: 8, 512>}]} {
    %c0 = arith.constant 0 : index
    %c0_0 = arith.constant 0 : index
    %0 = vector.load %arg1[%c0, %c0_0] : memref<8x512xf32, #tpu.memory_space<vmem>>, vector<8x512xf32>
    %c17_i32 = arith.constant 17 : i32
    %1 = tpu.dynamic_rotate %0 by %c17_i32 dim 1 : vector<8x512xf32>, i32 -> vector<8x512xf32>
    %c0_1 = arith.constant 0 : index
    %c0_2 = arith.constant 0 : index
    %2 = vector.load %arg4[%c0_1, %c0_2] : memref<27x512xf32, #tpu.memory_space<vmem>>, vector<1x512xf32>
    %3 = vector.broadcast %2 : vector<1x512xf32> to vector<8x512xf32>
    %4 = arith.mulf %1, %3 : vector<8x512xf32>
    %c16_i32 = arith.constant 16 : i32
    %5 = tpu.dynamic_rotate %0 by %c16_i32 dim 1 : vector<8x512xf32>, i32 -> vector<8x512xf32>
    %c1 = arith.constant 1 : index
    %c0_3 = arith.constant 0 : index
    %6 = vector.load %arg4[%c1, %c0_3] : memref<27x512xf32, #tpu.memory_space<vmem>>, vector<1x512xf32>
    %7 = vector.broadcast %6 : vector<1x512xf32> to vector<8x512xf32>
    %8 = arith.mulf %5, %7 : vector<8x512xf32>
    %c15_i32 = arith.constant 15 : i32
    %9 = tpu.dynamic_rotate %0 by %c15_i32 dim 1 : vector<8x512xf32>, i32 -> vector<8x512xf32>
    %c2 = arith.constant 2 : index
    %c0_4 = arith.constant 0 : index
    %10 = vector.load %arg4[%c2, %c0_4] : memref<27x512xf32, #tpu.memory_space<vmem>>, vector<1x512xf32>
    %11 = vector.broadcast %10 : vector<1x512xf32> to vector<8x512xf32>
    %12 = arith.mulf %9, %11 : vector<8x512xf32>
    %c1_i32 = arith.constant 1 : i32
    %13 = tpu.dynamic_rotate %0 by %c1_i32 dim 1 : vector<8x512xf32>, i32 -> vector<8x512xf32>
    %c3 = arith.constant 3 : index
    %c0_5 = arith.constant 0 : index
    %14 = vector.load %arg4[%c3, %c0_5] : memref<27x512xf32, #tpu.memory_space<vmem>>, vector<1x512xf32>
    %15 = vector.broadcast %14 : vector<1x512xf32> to vector<8x512xf32>
    %16 = arith.mulf %13, %15 : vector<8x512xf32>
    %c511_i32 = arith.constant 511 : i32
    %17 = tpu.dynamic_rotate %0 by %c511_i32 dim 1 : vector<8x512xf32>, i32 -> vector<8x512xf32>
    %c5 = arith.constant 5 : index
    %c0_6 = arith.constant 0 : index
    %18 = vector.load %arg4[%c5, %c0_6] : memref<27x512xf32, #tpu.memory_space<vmem>>, vector<1x512xf32>
    %19 = vector.broadcast %18 : vector<1x512xf32> to vector<8x512xf32>
    %20 = arith.mulf %17, %19 : vector<8x512xf32>
    %c497_i32 = arith.constant 497 : i32
    %21 = tpu.dynamic_rotate %0 by %c497_i32 dim 1 : vector<8x512xf32>, i32 -> vector<8x512xf32>
    %c6 = arith.constant 6 : index
    %c0_7 = arith.constant 0 : index
    %22 = vector.load %arg4[%c6, %c0_7] : memref<27x512xf32, #tpu.memory_space<vmem>>, vector<1x512xf32>
    %23 = vector.broadcast %22 : vector<1x512xf32> to vector<8x512xf32>
    %24 = arith.mulf %21, %23 : vector<8x512xf32>
    %c496_i32 = arith.constant 496 : i32
    %25 = tpu.dynamic_rotate %0 by %c496_i32 dim 1 : vector<8x512xf32>, i32 -> vector<8x512xf32>
    %c7 = arith.constant 7 : index
    %c0_8 = arith.constant 0 : index
    %26 = vector.load %arg4[%c7, %c0_8] : memref<27x512xf32, #tpu.memory_space<vmem>>, vector<1x512xf32>
    %27 = vector.broadcast %26 : vector<1x512xf32> to vector<8x512xf32>
    %28 = arith.mulf %25, %27 : vector<8x512xf32>
    %c495_i32 = arith.constant 495 : i32
    %29 = tpu.dynamic_rotate %0 by %c495_i32 dim 1 : vector<8x512xf32>, i32 -> vector<8x512xf32>
    %c8 = arith.constant 8 : index
    %c0_9 = arith.constant 0 : index
    %30 = vector.load %arg4[%c8, %c0_9] : memref<27x512xf32, #tpu.memory_space<vmem>>, vector<1x512xf32>
    %31 = vector.broadcast %30 : vector<1x512xf32> to vector<8x512xf32>
    %32 = arith.mulf %29, %31 : vector<8x512xf32>
    %33 = tpu.concatenate %4, %8, %12, %16, %0, %20, %24, %28, %32 in 0 : vector<8x512xf32>, vector<8x512xf32>, vector<8x512xf32>, vector<8x512xf32>, vector<8x512xf32>, vector<8x512xf32>, vector<8x512xf32>, vector<8x512xf32>, vector<8x512xf32> -> vector<72x512xf32>
    %c0_10 = arith.constant 0 : index
    %c0_11 = arith.constant 0 : index
    %34 = vector.load %arg2[%c0_10, %c0_11] : memref<32x72xf32, #tpu.memory_space<vmem>>, vector<8x72xf32>
    %c0_12 = arith.constant 0 : index
    %c0_13 = arith.constant 0 : index
    %35 = vector.load %arg3[%c0_12, %c0_13] : memref<32x1xf32, #tpu.memory_space<vmem>>, vector<8x1xf32>
    %cst = arith.constant dense<0.000000e+00> : vector<8x512xf32>
    %36 = tpu.matmul %34, %33, %cst {dimension_numbers = #tpu.dot_dimension_numbers<[1], [0], [0], [1], [0, 0, 1, 1], [], []>} : vector<8x72xf32>, vector<72x512xf32>, vector<8x512xf32> -> vector<8x512xf32>
    %37 = vector.broadcast %35 : vector<8x1xf32> to vector<8x512xf32>
    %38 = arith.addf %36, %37 : vector<8x512xf32>
    %cst_14 = arith.constant 0.000000e+00 : f32
    %39 = vector.broadcast %cst_14 : f32 to vector<8x512xf32>
    %40 = arith.maximumf %38, %39 : vector<8x512xf32>
    %c34_i32 = arith.constant 34 : i32
    %41 = tpu.dynamic_rotate %40 by %c34_i32 dim 1 : vector<8x512xf32>, i32 -> vector<8x512xf32>
    %c9 = arith.constant 9 : index
    %c0_15 = arith.constant 0 : index
    %42 = vector.load %arg4[%c9, %c0_15] : memref<27x512xf32, #tpu.memory_space<vmem>>, vector<1x512xf32>
    %43 = vector.broadcast %42 : vector<1x512xf32> to vector<8x512xf32>
    %44 = arith.mulf %41, %43 : vector<8x512xf32>
    %c32_i32 = arith.constant 32 : i32
    %45 = tpu.dynamic_rotate %40 by %c32_i32 dim 1 : vector<8x512xf32>, i32 -> vector<8x512xf32>
    %c10 = arith.constant 10 : index
    %c0_16 = arith.constant 0 : index
    %46 = vector.load %arg4[%c10, %c0_16] : memref<27x512xf32, #tpu.memory_space<vmem>>, vector<1x512xf32>
    %47 = vector.broadcast %46 : vector<1x512xf32> to vector<8x512xf32>
    %48 = arith.mulf %45, %47 : vector<8x512xf32>
    %c30_i32 = arith.constant 30 : i32
    %49 = tpu.dynamic_rotate %40 by %c30_i32 dim 1 : vector<8x512xf32>, i32 -> vector<8x512xf32>
    %c11 = arith.constant 11 : index
    %c0_17 = arith.constant 0 : index
    %50 = vector.load %arg4[%c11, %c0_17] : memref<27x512xf32, #tpu.memory_space<vmem>>, vector<1x512xf32>
    %51 = vector.broadcast %50 : vector<1x512xf32> to vector<8x512xf32>
    %52 = arith.mulf %49, %51 : vector<8x512xf32>
    %c2_i32 = arith.constant 2 : i32
    %53 = tpu.dynamic_rotate %40 by %c2_i32 dim 1 : vector<8x512xf32>, i32 -> vector<8x512xf32>
    %c12 = arith.constant 12 : index
    %c0_18 = arith.constant 0 : index
    %54 = vector.load %arg4[%c12, %c0_18] : memref<27x512xf32, #tpu.memory_space<vmem>>, vector<1x512xf32>
    %55 = vector.broadcast %54 : vector<1x512xf32> to vector<8x512xf32>
    %56 = arith.mulf %53, %55 : vector<8x512xf32>
    %c510_i32 = arith.constant 510 : i32
    %57 = tpu.dynamic_rotate %40 by %c510_i32 dim 1 : vector<8x512xf32>, i32 -> vector<8x512xf32>
    %c14 = arith.constant 14 : index
    %c0_19 = arith.constant 0 : index
    %58 = vector.load %arg4[%c14, %c0_19] : memref<27x512xf32, #tpu.memory_space<vmem>>, vector<1x512xf32>
    %59 = vector.broadcast %58 : vector<1x512xf32> to vector<8x512xf32>
    %60 = arith.mulf %57, %59 : vector<8x512xf32>
    %c482_i32 = arith.constant 482 : i32
    %61 = tpu.dynamic_rotate %40 by %c482_i32 dim 1 : vector<8x512xf32>, i32 -> vector<8x512xf32>
    %c15 = arith.constant 15 : index
    %c0_20 = arith.constant 0 : index
    %62 = vector.load %arg4[%c15, %c0_20] : memref<27x512xf32, #tpu.memory_space<vmem>>, vector<1x512xf32>
    %63 = vector.broadcast %62 : vector<1x512xf32> to vector<8x512xf32>
    %64 = arith.mulf %61, %63 : vector<8x512xf32>
    %c480_i32 = arith.constant 480 : i32
    %65 = tpu.dynamic_rotate %40 by %c480_i32 dim 1 : vector<8x512xf32>, i32 -> vector<8x512xf32>
    %c16 = arith.constant 16 : index
    %c0_21 = arith.constant 0 : index
    %66 = vector.load %arg4[%c16, %c0_21] : memref<27x512xf32, #tpu.memory_space<vmem>>, vector<1x512xf32>
    %67 = vector.broadcast %66 : vector<1x512xf32> to vector<8x512xf32>
    %68 = arith.mulf %65, %67 : vector<8x512xf32>
    %c478_i32 = arith.constant 478 : i32
    %69 = tpu.dynamic_rotate %40 by %c478_i32 dim 1 : vector<8x512xf32>, i32 -> vector<8x512xf32>
    %c17 = arith.constant 17 : index
    %c0_22 = arith.constant 0 : index
    %70 = vector.load %arg4[%c17, %c0_22] : memref<27x512xf32, #tpu.memory_space<vmem>>, vector<1x512xf32>
    %71 = vector.broadcast %70 : vector<1x512xf32> to vector<8x512xf32>
    %72 = arith.mulf %69, %71 : vector<8x512xf32>
    %73 = tpu.concatenate %44, %48, %52, %56, %40, %60, %64, %68, %72 in 0 : vector<8x512xf32>, vector<8x512xf32>, vector<8x512xf32>, vector<8x512xf32>, vector<8x512xf32>, vector<8x512xf32>, vector<8x512xf32>, vector<8x512xf32>, vector<8x512xf32> -> vector<72x512xf32>
    %c8_23 = arith.constant 8 : index
    %c0_24 = arith.constant 0 : index
    %74 = vector.load %arg2[%c8_23, %c0_24] : memref<32x72xf32, #tpu.memory_space<vmem>>, vector<8x72xf32>
    %c8_25 = arith.constant 8 : index
    %c0_26 = arith.constant 0 : index
    %75 = vector.load %arg3[%c8_25, %c0_26] : memref<32x1xf32, #tpu.memory_space<vmem>>, vector<8x1xf32>
    %cst_27 = arith.constant dense<0.000000e+00> : vector<8x512xf32>
    %76 = tpu.matmul %74, %73, %cst_27 {dimension_numbers = #tpu.dot_dimension_numbers<[1], [0], [0], [1], [0, 0, 1, 1], [], []>} : vector<8x72xf32>, vector<72x512xf32>, vector<8x512xf32> -> vector<8x512xf32>
    %77 = vector.broadcast %75 : vector<8x1xf32> to vector<8x512xf32>
    %78 = arith.addf %76, %77 : vector<8x512xf32>
    %cst_28 = arith.constant 0.000000e+00 : f32
    %79 = vector.broadcast %cst_28 : f32 to vector<8x512xf32>
    %80 = arith.maximumf %78, %79 : vector<8x512xf32>
    %c51_i32 = arith.constant 51 : i32
    %81 = tpu.dynamic_rotate %80 by %c51_i32 dim 1 : vector<8x512xf32>, i32 -> vector<8x512xf32>
    %c18 = arith.constant 18 : index
    %c0_29 = arith.constant 0 : index
    %82 = vector.load %arg4[%c18, %c0_29] : memref<27x512xf32, #tpu.memory_space<vmem>>, vector<1x512xf32>
    %83 = vector.broadcast %82 : vector<1x512xf32> to vector<8x512xf32>
    %84 = arith.mulf %81, %83 : vector<8x512xf32>
    %c48_i32 = arith.constant 48 : i32
    %85 = tpu.dynamic_rotate %80 by %c48_i32 dim 1 : vector<8x512xf32>, i32 -> vector<8x512xf32>
    %c19 = arith.constant 19 : index
    %c0_30 = arith.constant 0 : index
    %86 = vector.load %arg4[%c19, %c0_30] : memref<27x512xf32, #tpu.memory_space<vmem>>, vector<1x512xf32>
    %87 = vector.broadcast %86 : vector<1x512xf32> to vector<8x512xf32>
    %88 = arith.mulf %85, %87 : vector<8x512xf32>
    %c45_i32 = arith.constant 45 : i32
    %89 = tpu.dynamic_rotate %80 by %c45_i32 dim 1 : vector<8x512xf32>, i32 -> vector<8x512xf32>
    %c20 = arith.constant 20 : index
    %c0_31 = arith.constant 0 : index
    %90 = vector.load %arg4[%c20, %c0_31] : memref<27x512xf32, #tpu.memory_space<vmem>>, vector<1x512xf32>
    %91 = vector.broadcast %90 : vector<1x512xf32> to vector<8x512xf32>
    %92 = arith.mulf %89, %91 : vector<8x512xf32>
    %c3_i32 = arith.constant 3 : i32
    %93 = tpu.dynamic_rotate %80 by %c3_i32 dim 1 : vector<8x512xf32>, i32 -> vector<8x512xf32>
    %c21 = arith.constant 21 : index
    %c0_32 = arith.constant 0 : index
    %94 = vector.load %arg4[%c21, %c0_32] : memref<27x512xf32, #tpu.memory_space<vmem>>, vector<1x512xf32>
    %95 = vector.broadcast %94 : vector<1x512xf32> to vector<8x512xf32>
    %96 = arith.mulf %93, %95 : vector<8x512xf32>
    %c509_i32 = arith.constant 509 : i32
    %97 = tpu.dynamic_rotate %80 by %c509_i32 dim 1 : vector<8x512xf32>, i32 -> vector<8x512xf32>
    %c23 = arith.constant 23 : index
    %c0_33 = arith.constant 0 : index
    %98 = vector.load %arg4[%c23, %c0_33] : memref<27x512xf32, #tpu.memory_space<vmem>>, vector<1x512xf32>
    %99 = vector.broadcast %98 : vector<1x512xf32> to vector<8x512xf32>
    %100 = arith.mulf %97, %99 : vector<8x512xf32>
    %c467_i32 = arith.constant 467 : i32
    %101 = tpu.dynamic_rotate %80 by %c467_i32 dim 1 : vector<8x512xf32>, i32 -> vector<8x512xf32>
    %c24 = arith.constant 24 : index
    %c0_34 = arith.constant 0 : index
    %102 = vector.load %arg4[%c24, %c0_34] : memref<27x512xf32, #tpu.memory_space<vmem>>, vector<1x512xf32>
    %103 = vector.broadcast %102 : vector<1x512xf32> to vector<8x512xf32>
    %104 = arith.mulf %101, %103 : vector<8x512xf32>
    %c464_i32 = arith.constant 464 : i32
    %105 = tpu.dynamic_rotate %80 by %c464_i32 dim 1 : vector<8x512xf32>, i32 -> vector<8x512xf32>
    %c25 = arith.constant 25 : index
    %c0_35 = arith.constant 0 : index
    %106 = vector.load %arg4[%c25, %c0_35] : memref<27x512xf32, #tpu.memory_space<vmem>>, vector<1x512xf32>
    %107 = vector.broadcast %106 : vector<1x512xf32> to vector<8x512xf32>
    %108 = arith.mulf %105, %107 : vector<8x512xf32>
    %c461_i32 = arith.constant 461 : i32
    %109 = tpu.dynamic_rotate %80 by %c461_i32 dim 1 : vector<8x512xf32>, i32 -> vector<8x512xf32>
    %c26 = arith.constant 26 : index
    %c0_36 = arith.constant 0 : index
    %110 = vector.load %arg4[%c26, %c0_36] : memref<27x512xf32, #tpu.memory_space<vmem>>, vector<1x512xf32>
    %111 = vector.broadcast %110 : vector<1x512xf32> to vector<8x512xf32>
    %112 = arith.mulf %109, %111 : vector<8x512xf32>
    %113 = tpu.concatenate %84, %88, %92, %96, %80, %100, %104, %108, %112 in 0 : vector<8x512xf32>, vector<8x512xf32>, vector<8x512xf32>, vector<8x512xf32>, vector<8x512xf32>, vector<8x512xf32>, vector<8x512xf32>, vector<8x512xf32>, vector<8x512xf32> -> vector<72x512xf32>
    %c16_37 = arith.constant 16 : index
    %c0_38 = arith.constant 0 : index
    %114 = vector.load %arg2[%c16_37, %c0_38] : memref<32x72xf32, #tpu.memory_space<vmem>>, vector<8x72xf32>
    %c16_39 = arith.constant 16 : index
    %c0_40 = arith.constant 0 : index
    %115 = vector.load %arg3[%c16_39, %c0_40] : memref<32x1xf32, #tpu.memory_space<vmem>>, vector<8x1xf32>
    %cst_41 = arith.constant dense<0.000000e+00> : vector<8x512xf32>
    %116 = tpu.matmul %114, %113, %cst_41 {dimension_numbers = #tpu.dot_dimension_numbers<[1], [0], [0], [1], [0, 0, 1, 1], [], []>} : vector<8x72xf32>, vector<72x512xf32>, vector<8x512xf32> -> vector<8x512xf32>
    %117 = vector.broadcast %115 : vector<8x1xf32> to vector<8x512xf32>
    %118 = arith.addf %116, %117 : vector<8x512xf32>
    %cst_42 = arith.constant 0.000000e+00 : f32
    %119 = vector.broadcast %cst_42 : f32 to vector<8x512xf32>
    %120 = arith.maximumf %118, %119 : vector<8x512xf32>
    %c17_i32_43 = arith.constant 17 : i32
    %121 = tpu.dynamic_rotate %120 by %c17_i32_43 dim 1 : vector<8x512xf32>, i32 -> vector<8x512xf32>
    %c0_44 = arith.constant 0 : index
    %c0_45 = arith.constant 0 : index
    %122 = vector.load %arg4[%c0_44, %c0_45] : memref<27x512xf32, #tpu.memory_space<vmem>>, vector<1x512xf32>
    %123 = vector.broadcast %122 : vector<1x512xf32> to vector<8x512xf32>
    %124 = arith.mulf %121, %123 : vector<8x512xf32>
    %c16_i32_46 = arith.constant 16 : i32
    %125 = tpu.dynamic_rotate %120 by %c16_i32_46 dim 1 : vector<8x512xf32>, i32 -> vector<8x512xf32>
    %c1_47 = arith.constant 1 : index
    %c0_48 = arith.constant 0 : index
    %126 = vector.load %arg4[%c1_47, %c0_48] : memref<27x512xf32, #tpu.memory_space<vmem>>, vector<1x512xf32>
    %127 = vector.broadcast %126 : vector<1x512xf32> to vector<8x512xf32>
    %128 = arith.mulf %125, %127 : vector<8x512xf32>
    %c15_i32_49 = arith.constant 15 : i32
    %129 = tpu.dynamic_rotate %120 by %c15_i32_49 dim 1 : vector<8x512xf32>, i32 -> vector<8x512xf32>
    %c2_50 = arith.constant 2 : index
    %c0_51 = arith.constant 0 : index
    %130 = vector.load %arg4[%c2_50, %c0_51] : memref<27x512xf32, #tpu.memory_space<vmem>>, vector<1x512xf32>
    %131 = vector.broadcast %130 : vector<1x512xf32> to vector<8x512xf32>
    %132 = arith.mulf %129, %131 : vector<8x512xf32>
    %c1_i32_52 = arith.constant 1 : i32
    %133 = tpu.dynamic_rotate %120 by %c1_i32_52 dim 1 : vector<8x512xf32>, i32 -> vector<8x512xf32>
    %c3_53 = arith.constant 3 : index
    %c0_54 = arith.constant 0 : index
    %134 = vector.load %arg4[%c3_53, %c0_54] : memref<27x512xf32, #tpu.memory_space<vmem>>, vector<1x512xf32>
    %135 = vector.broadcast %134 : vector<1x512xf32> to vector<8x512xf32>
    %136 = arith.mulf %133, %135 : vector<8x512xf32>
    %c511_i32_55 = arith.constant 511 : i32
    %137 = tpu.dynamic_rotate %120 by %c511_i32_55 dim 1 : vector<8x512xf32>, i32 -> vector<8x512xf32>
    %c5_56 = arith.constant 5 : index
    %c0_57 = arith.constant 0 : index
    %138 = vector.load %arg4[%c5_56, %c0_57] : memref<27x512xf32, #tpu.memory_space<vmem>>, vector<1x512xf32>
    %139 = vector.broadcast %138 : vector<1x512xf32> to vector<8x512xf32>
    %140 = arith.mulf %137, %139 : vector<8x512xf32>
    %c497_i32_58 = arith.constant 497 : i32
    %141 = tpu.dynamic_rotate %120 by %c497_i32_58 dim 1 : vector<8x512xf32>, i32 -> vector<8x512xf32>
    %c6_59 = arith.constant 6 : index
    %c0_60 = arith.constant 0 : index
    %142 = vector.load %arg4[%c6_59, %c0_60] : memref<27x512xf32, #tpu.memory_space<vmem>>, vector<1x512xf32>
    %143 = vector.broadcast %142 : vector<1x512xf32> to vector<8x512xf32>
    %144 = arith.mulf %141, %143 : vector<8x512xf32>
    %c496_i32_61 = arith.constant 496 : i32
    %145 = tpu.dynamic_rotate %120 by %c496_i32_61 dim 1 : vector<8x512xf32>, i32 -> vector<8x512xf32>
    %c7_62 = arith.constant 7 : index
    %c0_63 = arith.constant 0 : index
    %146 = vector.load %arg4[%c7_62, %c0_63] : memref<27x512xf32, #tpu.memory_space<vmem>>, vector<1x512xf32>
    %147 = vector.broadcast %146 : vector<1x512xf32> to vector<8x512xf32>
    %148 = arith.mulf %145, %147 : vector<8x512xf32>
    %c495_i32_64 = arith.constant 495 : i32
    %149 = tpu.dynamic_rotate %120 by %c495_i32_64 dim 1 : vector<8x512xf32>, i32 -> vector<8x512xf32>
    %c8_65 = arith.constant 8 : index
    %c0_66 = arith.constant 0 : index
    %150 = vector.load %arg4[%c8_65, %c0_66] : memref<27x512xf32, #tpu.memory_space<vmem>>, vector<1x512xf32>
    %151 = vector.broadcast %150 : vector<1x512xf32> to vector<8x512xf32>
    %152 = arith.mulf %149, %151 : vector<8x512xf32>
    %153 = tpu.concatenate %124, %128, %132, %136, %120, %140, %144, %148, %152 in 0 : vector<8x512xf32>, vector<8x512xf32>, vector<8x512xf32>, vector<8x512xf32>, vector<8x512xf32>, vector<8x512xf32>, vector<8x512xf32>, vector<8x512xf32>, vector<8x512xf32> -> vector<72x512xf32>
    %c24_67 = arith.constant 24 : index
    %c0_68 = arith.constant 0 : index
    %154 = vector.load %arg2[%c24_67, %c0_68] : memref<32x72xf32, #tpu.memory_space<vmem>>, vector<8x72xf32>
    %c24_69 = arith.constant 24 : index
    %c0_70 = arith.constant 0 : index
    %155 = vector.load %arg3[%c24_69, %c0_70] : memref<32x1xf32, #tpu.memory_space<vmem>>, vector<8x1xf32>
    %cst_71 = arith.constant dense<0.000000e+00> : vector<8x512xf32>
    %156 = tpu.matmul %154, %153, %cst_71 {dimension_numbers = #tpu.dot_dimension_numbers<[1], [0], [0], [1], [0, 0, 1, 1], [], []>} : vector<8x72xf32>, vector<72x512xf32>, vector<8x512xf32> -> vector<8x512xf32>
    %157 = vector.broadcast %155 : vector<8x1xf32> to vector<8x512xf32>
    %158 = arith.addf %156, %157 : vector<8x512xf32>
    %cst_72 = arith.constant 0.000000e+00 : f32
    %159 = vector.broadcast %cst_72 : f32 to vector<8x512xf32>
    %160 = arith.maximumf %158, %159 : vector<8x512xf32>
    %161 = arith.addf %160, %0 : vector<8x512xf32>
    %c0_73 = arith.constant 0 : index
    %c0_74 = arith.constant 0 : index
    %162 = vector.load %arg5[%c0_73, %c0_74] : memref<8x512xf32, #tpu.memory_space<vmem>>, vector<8x512xf32>
    tpu.vector_store %arg5[%c0_73, %c0_74], %161 {strides = array<i32>} : memref<8x512xf32, #tpu.memory_space<vmem>>, vector<8x512xf32>,
    return
  }
  func.func @transform_0(%arg0: i32) -> (i32, i32) {
    %c0_i32 = arith.constant 0 : i32
    %c0_i32_0 = arith.constant 0 : i32
    %c0_i32_1 = arith.constant 0 : i32
    return %c0_i32, %c0_i32_0 : i32, i32
  }
  func.func @transform_1(%arg0: i32) -> (i32, i32) {
    %c0_i32 = arith.constant 0 : i32
    %c0_i32_0 = arith.constant 0 : i32
    %c0_i32_1 = arith.constant 0 : i32
    return %c0_i32, %c0_i32_0 : i32, i32
  }
  func.func @transform_2(%arg0: i32) -> (i32, i32) {
    %c0_i32 = arith.constant 0 : i32
    %c0_i32_0 = arith.constant 0 : i32
    %c0_i32_1 = arith.constant 0 : i32
    return %c0_i32, %c0_i32_0 : i32, i32
  }
  func.func @transform_3(%arg0: i32) -> (i32, i32) {
    %c0_i32 = arith.constant 0 : i32
    %c0_i32_0 = arith.constant 0 : i32
    %c0_i32_1 = arith.constant 0 : i32
    return %c0_i32, %c0_i32_0 : i32, i32
  }
  func.func @transform_4(%arg0: i32) -> (i32, i32) {
    %c0_i32 = arith.constant 0 : i32
    %c0_i32_0 = arith.constant 0 : i32
    %c0_i32_1 = arith.constant 0 : i32
    return %c0_i32, %c0_i32_0 : i32, i32
  }
}

</mosaic_0001>

<bundles_post_ra>
// kernel: respath1_forward.1
= control target key start
LH: loop header
LB: loop body
LE: loop exit
PB: predicated region body
PF: predicated region fallthrough
CT: control target
= control target key end

     0   :  { %s1281_s21 = smov 111   ;;  %s1282_s22 = smov 112   ;;  %v29_v6 = vlaneseq  ;;  %vm253_vm8 = vcmask 588800   ;;  %s2326_s0 = inlined_call_operand.vmem [shape: f32[8,512], index: 0, kind: input, shape index: {}]   ;;  %s2327_s3 = inlined_call_operand.vmem [shape: f32[27,512], index: 3, kind: input, shape index: {}]   ;;  %s2328_s2 = inlined_call_operand.vmem [shape: f32[32,1], index: 2, kind: input, shape index: {}]   ;;  %s2329_s1 = inlined_call_operand.vmem [shape: f32[32,72], index: 1, kind: input, shape index: {}]   ;;  %s2330_s4 = inlined_call_operand.vmem [shape: f32[8,512], index: 4, kind: output, shape index: {}]  }
   0x1   :  { %v1334_v0 = vld [vmem:[%s2326_s0 + $0x18] sm:$0xff]  ;;  %v1339_v1 = vld [vmem:[%s2326_s0 + $0x10] sm:$0xff]  ;;  %v1344_v2 = vld [vmem:[%s2326_s0] sm:$0xff]  ;;  %s1283_s23 = smov 113   ;;  %s1284_s24 = smov 127  }
   0x2   :  { %224 = vrot.lane.b32.xlu1 %v1334_v0, %s1281_s21  ;;  %194 = vrot.lane.b32.xlu2 %v1339_v1, %s1282_s22  ;;  %v1373_v3 = vld [vmem:[%s2326_s0 + $0x8] sm:$0xff]  ;;  %s1285_s27 = smov 1   ;;  %s1286_s28 = smov 15   ;;  %v1417_v7 = vand.u32 127, %v29_v6 }
   0x3   :  { %218 = vrot.lane.b32.xlu0 %v1344_v2, %s1281_s21  ;;  %s1287_s29 = smov 16   ;;  %s1288_s30 = smov 17   ;;  %v1422_v8 = vld [vmem:[%s2327_s3 + $0x20] ss:$8 sm:$0xf] }
   0x4   :  { %vm226_vm0 = vcmp.lt.s32.totalorder %v1417_v7, 111  ;;  %v237_v9 = vperm.slane %v1422_v8, 3  ;;  %v1433_v15 = vld [vmem:[%s2327_s3 + $0x7] ss:$8 sm:$0xf]  ;;  %vm198_vm1 = vcmp.lt.s32.totalorder %v1417_v7, 112 }
   0x5   :  { %v209_v16 = vperm.slane %v1433_v15, 3  ;;  %v236_v17 = vperm.slane %v1422_v8, 2  ;;  %v208_v21 = vperm.slane %v1433_v15, 2  ;;  %v1453_v27 = vld [vmem:[%s2327_s3 + $0x6] ss:$8 sm:$0xf] }
   0x6   :  { %v180_v29 = vperm.slane %v1453_v27, 2  ;;  %vm170_vm2 = vcmp.lt.s32.totalorder %v1417_v7, 113  ;;  %v181_v30 = vperm.slane %v1453_v27, 3  ;;  %v1473_v38 = vld [vmem:[%s2327_s3 + $0x5] ss:$8 sm:$0xf] }
   0x7   :  { %v152_v39 = vperm.slane %v1473_v38, 2  ;;  %vm142_vm3 = vcmp.lt.s32.totalorder %v1417_v7, 127  ;;  %v153_v40 = vperm.slane %v1473_v38, 3  ;;  %v234_v48 = vperm.slane %v1422_v8, 0  ;;  %s1290_s7 = smov 94   ;;  %s1291_s8 = smov 2  }
   0x8   :  { %v235_v49 = vperm.slane %v1422_v8, 1  ;;  %v206_v52 = vperm.slane %v1433_v15, 0  ;;  %v207_v53 = vperm.slane %v1433_v15, 1  ;;  %v178_v60 = vperm.slane %v1453_v27, 0  ;;  %s1292_s9 = smov 96   ;;  %s1293_s10 = smov 98  }
   0x9   :  { %v179_v61 = vperm.slane %v1453_v27, 1  ;;  %vm114_vm4 = vcmp.lt.s32.totalorder %v1417_v7, 1  ;;  %vm86_vm5 = vcmp.lt.s32.totalorder %v1417_v7, 15  ;;  %vm58_vm6 = vcmp.lt.s32.totalorder %v1417_v7, 16  ;;  %s1294_s11 = smov 32   ;;  %s1295_s12 = smov 34  }
   0xa   :  { %196 = vrot.lane.b32.xlu2 %v1334_v0, %s1282_s22  ;;  %190 = vrot.lane.b32.xlu1 %v1344_v2, %s1282_s22  ;;  %vm31_vm7 = vcmp.lt.s32.totalorder %v1417_v7, 17  ;;  %s1296_s13 = smov 126   ;;  %s1297_s14 = smov 30   ;;  %vm545_vm9 = vcmp.lt.s32.totalorder %v1417_v7, 94  ;;  %vm517_vm10 = vcmp.lt.s32.totalorder %v1417_v7, 96  ;;  %vm489_vm11 = vcmp.lt.s32.totalorder %v1417_v7, 98 }
   0xb   :  { %222 = vrot.lane.b32.xlu0 %v1339_v1, %s1281_s21  ;;  %vm461_vm12 = vcmp.lt.s32.totalorder %v1417_v7, 126  ;;  %vm433_vm13 = vcmp.lt.s32.totalorder %v1417_v7, 2  ;;  %vm377_vm14 = vcmp.lt.s32.totalorder %v1417_v7, 32  ;;  %vm349_vm15 = vcmp.lt.s32.totalorder %v1417_v7, 34  ;;  %s1298_s17 = smov 77   ;;  %s1299_s18 = smov 3  }
   0xc   :  { %s1300_s19 = smov 80   ;;  %s1301_s20 = smov 83  }
   0xd   :  { %s1302_s25 = smov 48   ;;  %s1303_s26 = smov 51  }
   0xe   :  { %s1304_s5 = smov 125   ;;  %s1305_s6 = smov 45  }
  0x12   :  { %168 = vrot.lane.b32.xlu2 %v1334_v0, %s1283_s23  ;;  %166 = vrot.lane.b32.xlu1 %v1339_v1, %s1283_s23 }
  0x13   :  { %162 = vrot.lane.b32.xlu0 %v1344_v2, %s1283_s23 }
  0x1a   :  { %140 = vrot.lane.b32.xlu2 %v1334_v0, %s1284_s24  ;;  %138 = vrot.lane.b32.xlu1 %v1339_v1, %s1284_s24 }
  0x1b   :  { %134 = vrot.lane.b32.xlu0 %v1344_v2, %s1284_s24 }
  0x22   :  { %108 = vrot.lane.b32.xlu2 %v1373_v3, %s1285_s27  ;;  %192 = vrot.lane.b32.xlu1 %v1373_v3, %s1282_s22 }
  0x23   :  { %220 = vrot.lane.b32.xlu0 %v1373_v3, %s1281_s21 }
  0x2a   :  { %164 = vrot.lane.b32.xlu2 %v1373_v3, %s1283_s23  ;;  %112 = vrot.lane.b32.xlu1 %v1334_v0, %s1285_s27 }
  0x2b   :  { %110 = vrot.lane.b32.xlu0 %v1339_v1, %s1285_s27 }
  0x32   :  { %84 = vrot.lane.b32.xlu2 %v1334_v0, %s1286_s28  ;;  %82 = vrot.lane.b32.xlu1 %v1339_v1, %s1286_s28 }
  0x33   :  { %80 = vrot.lane.b32.xlu0 %v1373_v3, %s1286_s28 }
  0x3a   :  { %54 = vrot.lane.b32.xlu2 %v1339_v1, %s1287_s29  ;;  %52 = vrot.lane.b32.xlu1 %v1373_v3, %s1287_s29 }
  0x3b   :  { %136 = vrot.lane.b32.xlu0 %v1373_v3, %s1284_s24 }
  0x42   :  { %25 = vrot.lane.b32.xlu2 %v1339_v1, %s1288_s30  ;;  %23 = vrot.lane.b32.xlu1 %v1373_v3, %s1288_s30 }
  0x43   :  { %56 = vrot.lane.b32.xlu0 %v1334_v0, %s1287_s29 }
  0x4a   :  { %78 = vrot.lane.b32.xlu2 %v1344_v2, %s1286_s28  ;;  %106 = vrot.lane.b32.xlu1 %v1344_v2, %s1285_s27 }
  0x4b   :  { %27 = vrot.lane.b32.xlu0 %v1334_v0, %s1288_s30 }
  0x52   :  { %21 = vrot.lane.b32.xlu1 %v1344_v2, %s1288_s30 }
  0x53   :  { %50 = vrot.lane.b32.xlu0 %v1344_v2, %s1287_s29 }
  0x5c   :  { %v1415_v4 = vpop.permute.xlu2 %194 }
  0x64   :  { %v197_v5 = vpop.permute.xlu2 %196 }
  0x65   :  { %v199_v22 = vsel %vm198_vm1, %v1415_v4, %v197_v5 }
  0x66   :  { %v216_v28 = vmul.f32 %v208_v21, %v199_v22 }
  0x6c   :  { %v169_v10 = vpop.permute.xlu2 %168 }
  0x74   :  { %v225_v11 = vpop.permute.xlu1 %224  ;;  %v141_v23 = vpop.permute.xlu2 %140 }
  0x75   :  { %v219_v12 = vpop.permute.xlu0 %218 }
  0x76   :  { %v230_v13 = vsel %vm226_vm0, %v225_v11, %v219_v12 }
  0x77   :  { %v245_v14 = vmul.f32 %v237_v9, %v230_v13 }
  0x79   :  { %324 = vmatpush.msra.mxu3 %v245_v14 }
  0x7c   :  { %v191_v18 = vpop.permute.xlu1 %190  ;;  %v1468_v37 = vpop.permute.xlu2 %108 }
  0x7d   :  { %v202_v19 = vsel %vm198_vm1, %v197_v5, %v191_v18  ;;  %v223_v20 = vpop.permute.xlu0 %222 }
  0x7e   :  { %v227_v24 = vsel %vm226_vm0, %v223_v20, %v225_v11  ;;  %v217_v25 = vmul.f32 %v209_v16, %v202_v19 }
  0x7f   :  { %v244_v26 = vmul.f32 %v236_v17, %v227_v24 }
  0x80   :  { %325 = vmatpush.msra.mxu3 %v217_v25 }
  0x81   :  { %304 = vmatpush.msra.mxu2 %v244_v26 }
  0x83   :  { %305 = vmatpush.msra.mxu2 %v216_v28 }
  0x84   :  { %v167_v31 = vpop.permute.xlu1 %166  ;;  %v165_v47 = vpop.permute.xlu2 %164 }
  0x85   :  { %v171_v32 = vsel %vm170_vm2, %v167_v31, %v169_v10  ;;  %v163_v33 = vpop.permute.xlu0 %162  ;;  %v172_v62 = vsel %vm170_vm2, %v165_v47, %v167_v31 }
  0x86   :  { %v174_v34 = vsel %vm170_vm2, %v169_v10, %v163_v33  ;;  %v188_v35 = vmul.f32 %v180_v29, %v171_v32  ;;  %v173_v63 = vsel %vm170_vm2, %v163_v33, %v165_v47  ;;  %v187_v6 = vmul.f32 %v179_v61, %v172_v62  ;;  %v247_v47 = vld [vmem:[%s2328_s2] sm:$0xff] }
  0x87   :  { %v189_v36 = vmul.f32 %v181_v30, %v174_v34  ;;  %v186_v5 = vmul.f32 %v178_v60, %v173_v63  ;;  %v1596_v62 = vld [vmem:[%s2327_s3] ss:$8 sm:$0xf] }
  0x88   :  { %306 = vmatpush.msra.mxu2 %v188_v35 }
  0x89   :  { %326 = vmatpush.msra.mxu3 %v189_v36  ;;  %v1567_v36 = vld [vmem:[%s2327_s3 + $0x1] ss:$8 sm:$0xf] }
  0x8a   :  { %v2341_v63 = vperm.slane %v1567_v36, 3 }
  0x8c   :  { %v1478_v41 = vpop.permute.xlu1 %138 }
  0x8d   :  { %v143_v42 = vsel %vm142_vm3, %v1478_v41, %v141_v23  ;;  %v1483_v43 = vpop.permute.xlu0 %134 }
  0x8e   :  { %v146_v44 = vsel %vm142_vm3, %v141_v23, %v1483_v43  ;;  %v160_v45 = vmul.f32 %v152_v39, %v143_v42  ;;  %v1550_v23 = vld [vmem:[%s2327_s3 + $0x2] ss:$8 sm:$0xf]  ;;  %v2342_v42 = vperm.slane %v1567_v36, 2 }
  0x8f   :  { %v161_v46 = vmul.f32 %v153_v40, %v146_v44  ;;  %v2343_v24 = vperm.slane %v1550_v23, 3  ;;  %v2344_v25 = vperm.slane %v1550_v23, 2  ;;  %v150_v44 = vperm.slane %v1473_v38, 0 }
  0x90   :  { %307 = vmatpush.msra.mxu2 %v160_v45  ;;  %v151_v45 = vperm.slane %v1473_v38, 1 }
  0x91   :  { %327 = vmatpush.msra.mxu3 %v161_v46 }
  0x92   :  { %308 = vmatpush.msra.mxu2 %v1339_v1 }
  0x93   :  { %328 = vmatpush.msra.mxu3 %v1334_v0  ;;  %v1520_v0 = vld [vmem:[%s2327_s3 + $0x3] ss:$8 sm:$0xf] }
  0x94   :  { %v193_v50 = vpop.permute.xlu1 %192  ;;  %v124_v10 = vperm.slane %v1520_v0, 2  ;;  %v125_v11 = vperm.slane %v1520_v0, 3 }
  0x95   :  { %v221_v51 = vpop.permute.xlu0 %220  ;;  %v200_v54 = vsel %vm198_vm1, %v193_v50, %v1415_v4  ;;  %v201_v55 = vsel %vm198_vm1, %v191_v18, %v193_v50 }
  0x96   :  { %v229_v56 = vsel %vm226_vm0, %v219_v12, %v221_v51  ;;  %v228_v57 = vsel %vm226_vm0, %v221_v51, %v223_v20  ;;  %v214_v1 = vmul.f32 %v206_v52, %v201_v55  ;;  %v215_v4 = vmul.f32 %v207_v53, %v200_v54  ;;  %v1533_v12 = vpop.permute.xlu2 %84 }
  0x97   :  { %v242_v58 = vmul.f32 %v234_v48, %v229_v56  ;;  %v243_v59 = vmul.f32 %v235_v49, %v228_v57  ;;  %v1289_v54 = vmov 0  }
  0x98   :  { %1275 = vset.pattern.permute.xlu2 %v1289_v54  ;;  %1276 = vset.pattern.permute.xlu0 %v1289_v54 }
  0x99   :  { %264 = vmatpush.msra.mxu0 %v242_v58  ;;  %284 = vmatpush.msra.mxu1 %v243_v59 }
  0x9a   :  { %250 = vperm.xlu2 %1275, %v247_v47  }
  0x9b   :  { %265 = vmatpush.msra.mxu0 %v214_v1  ;;  %285 = vmatpush.msra.mxu1 %v215_v4 }
  0x9c   :  { %v1535_v13 = vpop.permute.xlu1 %112 }
  0x9d   :  { %266 = vmatpush.msra.mxu0 %v186_v5  ;;  %286 = vmatpush.msra.mxu1 %v187_v6  ;;  %v111_v14 = vpop.permute.xlu0 %110 }
  0x9e   :  { %v115_v18 = vsel %vm114_vm4, %v111_v14, %v1535_v13  ;;  %v116_v19 = vsel %vm114_vm4, %v1468_v37, %v111_v14  ;;  %v55_v32 = vpop.permute.xlu2 %54 }
  0x9f   :  { %v132_v20 = vmul.f32 %v124_v10, %v116_v19  ;;  %v133_v22 = vmul.f32 %v125_v11, %v115_v18  ;;  %v246_v18 = vld [vmem:[%s2329_s1] sm:$0xff]  ;;  %v2338_v19 = vperm.slane %v1520_v0, 0 }
  0xa1   :  { %309 = vmatpush.msra.mxu2 %v132_v20  ;;  %329 = vmatpush.msra.mxu3 %v133_v22  ;;  %v2337_v20 = vperm.slane %v1520_v0, 1  ;;  %v2339_v22 = vperm.slane %v1596_v62, 3 }
  0xa4   :  { %v83_v26 = vpop.permute.xlu1 %82 }
  0xa5   :  { %v87_v28 = vsel %vm86_vm5, %v83_v26, %v1533_v12  ;;  %v81_v31 = vpop.permute.xlu0 %80 }
  0xa6   :  { %v88_v33 = vsel %vm86_vm5, %v81_v31, %v83_v26  ;;  %v105_v34 = vmul.f32 %v2343_v24, %v87_v28  ;;  %v2336_v28 = vperm.slane %v1550_v23, 0 }
  0xa7   :  { %v104_v35 = vmul.f32 %v2344_v25, %v88_v33 }
  0xa8   :  { %330 = vmatpush.msra.mxu3 %v105_v34 }
  0xa9   :  { %310 = vmatpush.msra.mxu2 %v104_v35 }
  0xac   :  { %v1573_v46 = vpop.permute.xlu1 %52 }
  0xad   :  { %v60_v50 = vsel %vm58_vm6, %v1573_v46, %v55_v32  ;;  %v137_v51 = vpop.permute.xlu0 %136 }
  0xae   :  { %v144_v55 = vsel %vm142_vm3, %v137_v51, %v1478_v41  ;;  %v145_v56 = vsel %vm142_vm3, %v1483_v43, %v137_v51  ;;  %v76_v57 = vmul.f32 %v2342_v42, %v60_v50  ;;  %v26_v41 = vpop.permute.xlu2 %25  ;;  %v2340_v43 = vperm.slane %v1596_v62, 2 }
  0xaf   :  { %v158_v58 = vmul.f32 %v150_v44, %v145_v56  ;;  %v159_v59 = vmul.f32 %v151_v45, %v144_v55  ;;  %v2334_v55 = vperm.slane %v1567_v36, 0  ;;  %v2333_v56 = vperm.slane %v1567_v36, 1 }
  0xb0   :  { %311 = vmatpush.msra.mxu2 %v76_v57 }
  0xb1   :  { %267 = vmatpush.msra.mxu0 %v158_v58  ;;  %287 = vmatpush.msra.mxu1 %v159_v59  ;;  %v2332_v59 = vperm.slane %v1596_v62, 0 }
  0xb3   :  { %268 = vmatpush.msra.mxu0 %v1344_v2  ;;  %288 = vmatpush.msra.mxu1 %v1373_v3 }
  0xb4   :  { %v24_v1 = vpop.permute.xlu1 %23 }
  0xb5   :  { %v33_v4 = vsel %vm31_vm7, %v24_v1, %v26_v41  ;;  %v57_v5 = vpop.permute.xlu0 %56 }
  0xb6   :  { %v59_v6 = vsel %vm58_vm6, %v55_v32, %v57_v5  ;;  %v48_v14 = vmul.f32 %v2340_v43, %v33_v4  ;;  %v79_v3 = vpop.permute.xlu2 %78  ;;  %v2335_v32 = vperm.slane %v1550_v23, 1 }
  0xb7   :  { %v77_v2 = vmul.f32 %v2341_v63, %v59_v6  ;;  %v90_v33 = vsel %vm86_vm5, %v1533_v12, %v79_v3  ;;  %v89_v34 = vsel %vm86_vm5, %v79_v3, %v81_v31 }
  0xb8   :  { %312 = vmatpush.msra.mxu2 %v48_v14 }
  0xb9   :  { %331 = vmatpush.msra.mxu3 %v77_v2  ;;  %1220 = vmatmul.msk.f32.vlgmr.msra.gmra.mxu2 %vm253_vm8, %v246_v18 }
  0xbc   :  { %v107_v26 = vpop.permute.xlu1 %106 }
  0xbd   :  { %v117_v35 = vsel %vm114_vm4, %v107_v26, %v1468_v37  ;;  %v118_v47 = vsel %vm114_vm4, %v1535_v13, %v107_v26  ;;  %v28_v50 = vpop.permute.xlu0 %27  ;;  %v102_v37 = vmul.f32 %v2336_v28, %v90_v33  ;;  %v103_v13 = vmul.f32 %v2335_v32, %v89_v34 }
  0xbe   :  { %v32_v51 = vsel %vm31_vm7, %v26_v41, %v28_v50  ;;  %v130_v54 = vmul.f32 %v2338_v19, %v118_v47  ;;  %v131_v12 = vmul.f32 %v2337_v20, %v117_v35  ;;  %v2331_v41 = vperm.slane %v1596_v62, 1 }
  0xbf   :  { %v49_v31 = vmul.f32 %v2339_v22, %v32_v51 }
  0xc0   :  { %269 = vmatpush.msra.mxu0 %v130_v54  ;;  %289 = vmatpush.msra.mxu1 %v131_v12 }
  0xc1   :  { %332 = vmatpush.msra.mxu3 %v49_v31 }
  0xc2   :  { %270 = vmatpush.msra.mxu0 %v102_v37  ;;  %290 = vmatpush.msra.mxu1 %v103_v13 }
  0xc3   :  { %1221 = vmatmul.msk.f32.vlgmr.msra.gmra.mxu3 %vm253_vm8, %v246_v18 }
  0xc4   :  { %v22_v57 = vpop.permute.xlu1 %21 }
  0xc5   :  { %v51_v58 = vpop.permute.xlu0 %50  ;;  %v34_v4 = vsel %vm31_vm7, %v22_v57, %v24_v1  ;;  %v35_v6 = vsel %vm31_vm7, %v28_v50, %v22_v57  ;;  %v566_v57 = vld [vmem:[%s2328_s2 + $0x8] sm:$0xff] }
  0xc6   :  { %v61_v14 = vsel %vm58_vm6, %v51_v58, %v1573_v46  ;;  %v62_v2 = vsel %vm58_vm6, %v57_v5, %v51_v58  ;;  %v46_v1 = vmul.f32 %v2332_v59, %v35_v6  ;;  %v47_v33 = vmul.f32 %v2331_v41, %v34_v4 }
  0xc7   :  { %v74_v3 = vmul.f32 %v2334_v55, %v62_v2  ;;  %v75_v26 = vmul.f32 %v2333_v56, %v61_v14  ;;  %v1229_v14 = vld [vmem:[%s2327_s3 + $0x41] ss:$8 sm:$0xf] }
  0xc8   :  { %v556_v2 = vperm.slane %v1229_v14, 3  ;;  %v554_v20 = vperm.slane %v1229_v14, 1 }
  0xc9   :  { %271 = vmatpush.msra.mxu0 %v74_v3  ;;  %291 = vmatpush.msra.mxu1 %v75_v26 }
  0xcb   :  { %272 = vmatpush.msra.mxu0 %v46_v1  ;;  %292 = vmatpush.msra.mxu1 %v47_v33 }
  0xcc   :  { %1218 = vmatmul.msk.f32.vlgmr.msra.gmra.mxu0 %vm253_vm8, %v246_v18  ;;  %1219 = vmatmul.msk.f32.vlgmr.msra.gmra.mxu1 %vm253_vm8, %v246_v18 }
  0xf4   :  { %v251_v46 = vpop.permute.xlu2 %250 }
 0x13c   :  { %v314_v31 = vpop.f32.mrf.mxu2 }
 0x13d   :  { %v315_v37 = vadd.f32 %v314_v31, %v251_v46  ;;  %v1227_v31 = vld [vmem:[%s2327_s3 + $0x27] ss:$8 sm:$0xf] }
 0x13f   :  { %v1685_v13 = vmax.f32 %v315_v37, 0.0 }
 0x146   :  { %v334_v18 = vpop.f32.mrf.mxu3 }
 0x147   :  { %v335_v54 = vadd.f32 %v334_v18, %v251_v46 }
 0x149   :  { %v274_v5 = vpop.f32.mrf.mxu0  ;;  %v294_v34 = vpop.f32.mrf.mxu1  ;;  %v1679_v12 = vmax.f32 %v335_v54, 0.0 }
 0x14a   :  { %v275_v35 = vadd.f32 %v274_v5, %v251_v46  ;;  %v295_v47 = vadd.f32 %v294_v34, %v251_v46  ;;  %v1228_v46 = vld [vmem:[%s2327_s3 + $0x40] ss:$8 sm:$0xf] }
 0x14b   :  { %v528_v34 = vperm.slane %v1228_v46, 3  ;;  %v527_v19 = vperm.slane %v1228_v46, 2  ;;  %v525_v43 = vperm.slane %v1228_v46, 0  ;;  %v526_v63 = vperm.slane %v1228_v46, 1 }
 0x14c   :  { %v1667_v50 = vmax.f32 %v275_v35, 0.0  ;;  %v1669_v51 = vmax.f32 %v295_v47, 0.0 }
 0x14e   :  { %537 = vrot.lane.b32.xlu0 %v1667_v50, %s1290_s7  ;;  %427 = vrot.lane.b32.xlu2 %v1669_v51, %s1291_s8 }
 0x14f   :  { %511 = vrot.lane.b32.xlu1 %v1669_v51, %s1292_s9 }
 0x156   :  { %509 = vrot.lane.b32.xlu0 %v1667_v50, %s1292_s9  ;;  %483 = vrot.lane.b32.xlu2 %v1669_v51, %s1293_s10 }
 0x157   :  { %371 = vrot.lane.b32.xlu1 %v1669_v51, %s1294_s11 }
 0x15e   :  { %481 = vrot.lane.b32.xlu0 %v1667_v50, %s1293_s10  ;;  %543 = vrot.lane.b32.xlu2 %v1679_v12, %s1290_s7 }
 0x15f   :  { %343 = vrot.lane.b32.xlu1 %v1669_v51, %s1295_s12 }
 0x166   :  { %453 = vrot.lane.b32.xlu0 %v1667_v50, %s1296_s13  ;;  %515 = vrot.lane.b32.xlu2 %v1679_v12, %s1292_s9 }
 0x167   :  { %541 = vrot.lane.b32.xlu1 %v1685_v13, %s1290_s7 }
 0x16e   :  { %487 = vrot.lane.b32.xlu2 %v1679_v12, %s1293_s10  ;;  %539 = vrot.lane.b32.xlu0 %v1669_v51, %s1290_s7 }
 0x16f   :  { %513 = vrot.lane.b32.xlu1 %v1685_v13, %s1292_s9 }
 0x176   :  { %459 = vrot.lane.b32.xlu2 %v1679_v12, %s1296_s13  ;;  %399 = vrot.lane.b32.xlu0 %v1669_v51, %s1297_s14 }
 0x177   :  { %485 = vrot.lane.b32.xlu1 %v1685_v13, %s1293_s10 }
 0x17e   :  { %403 = vrot.lane.b32.xlu2 %v1679_v12, %s1297_s14  ;;  %455 = vrot.lane.b32.xlu0 %v1669_v51, %s1296_s13 }
 0x17f   :  { %457 = vrot.lane.b32.xlu1 %v1685_v13, %s1296_s13 }
 0x186   :  { %373 = vrot.lane.b32.xlu2 %v1685_v13, %s1294_s11  ;;  %429 = vrot.lane.b32.xlu0 %v1685_v13, %s1291_s8 }
 0x187   :  { %431 = vrot.lane.b32.xlu1 %v1679_v12, %s1291_s8 }
 0x18e   :  { %345 = vrot.lane.b32.xlu2 %v1685_v13, %s1295_s12  ;;  %375 = vrot.lane.b32.xlu0 %v1679_v12, %s1294_s11 }
 0x18f   :  { %401 = vrot.lane.b32.xlu1 %v1685_v13, %s1297_s14 }
 0x196   :  { %397 = vrot.lane.b32.xlu2 %v1667_v50, %s1297_s14  ;;  %347 = vrot.lane.b32.xlu0 %v1679_v12, %s1295_s12 }
 0x197   :  { %425 = vrot.lane.b32.xlu1 %v1667_v50, %s1291_s8 }
 0x19e   :  { %569 = vperm.xlu2 %1275, %v566_v57   ;;  %369 = vrot.lane.b32.xlu0 %v1667_v50, %s1294_s11  ;;  %v500_v57 = vperm.slane %v1227_v31, 3 }
 0x19f   :  { %341 = vrot.lane.b32.xlu1 %v1667_v50, %s1295_s12 }
 0x1a8   :  { %v1722_v58 = vpop.permute.xlu2 %427 }
 0x1b0   :  { %v1724_v4 = vpop.permute.xlu2 %483 }
 0x1b8   :  { %v544_v6 = vpop.permute.xlu2 %543 }
 0x1c0   :  { %v538_v3 = vpop.permute.xlu0 %537  ;;  %v516_v5 = vpop.permute.xlu2 %515 }
 0x1c1   :  { %v549_v26 = vsel %vm545_vm9, %v544_v6, %v538_v3  ;;  %v512_v1 = vpop.permute.xlu1 %511 }
 0x1c2   :  { %v564_v33 = vmul.f32 %v556_v2, %v549_v26 }
 0x1c4   :  { %642 = vmatpush.msrb.mxu3 %v564_v33 }
 0x1c8   :  { %v510_v35 = vpop.permute.xlu0 %509  ;;  %v488_v37 = vpop.permute.xlu2 %487 }
 0x1c9   :  { %v521_v47 = vsel %vm517_vm10, %v516_v5, %v510_v35  ;;  %v1738_v18 = vpop.permute.xlu1 %371  ;;  %v520_v42 = vsel %vm517_vm10, %v510_v35, %v512_v1 }
 0x1ca   :  { %v536_v54 = vmul.f32 %v528_v34, %v521_v47  ;;  %v1751_v34 = vld [vmem:[%s2327_s3 + $0x26] ss:$8 sm:$0xf] }
 0x1cb   :  { %v472_v47 = vperm.slane %v1751_v34, 3 }
 0x1cc   :  { %643 = vmatpush.msrb.mxu3 %v536_v54  ;;  %v555_v54 = vperm.slane %v1229_v14, 2 }
 0x1d0   :  { %v482_v2 = vpop.permute.xlu0 %481  ;;  %v460_v59 = vpop.permute.xlu2 %459 }
 0x1d1   :  { %v493_v26 = vsel %vm489_vm11, %v488_v37, %v482_v2  ;;  %v1746_v33 = vpop.permute.xlu1 %343  ;;  %v492_v46 = vsel %vm489_vm11, %v482_v2, %v1724_v4 }
 0x1d2   :  { %v508_v41 = vmul.f32 %v500_v57, %v493_v26 }
 0x1d4   :  { %644 = vmatpush.msrb.mxu3 %v508_v41  ;;  %v553_v41 = vperm.slane %v1229_v14, 0 }
 0x1d8   :  { %v454_v56 = vpop.permute.xlu0 %453 }
 0x1d9   :  { %v465_v55 = vsel %vm461_vm12, %v460_v59, %v454_v56  ;;  %v542_v32 = vpop.permute.xlu1 %541 }
 0x1da   :  { %v546_v57 = vsel %vm545_vm9, %v542_v32, %v544_v6  ;;  %v480_v26 = vmul.f32 %v472_v47, %v465_v55  ;;  %v497_v6 = vperm.slane %v1227_v31, 0 }
 0x1db   :  { %v563_v28 = vmul.f32 %v555_v54, %v546_v57  ;;  %v1773_v57 = vpop.permute.xlu2 %403 }
 0x1dc   :  { %645 = vmatpush.msrb.mxu3 %v480_v26 }
 0x1dd   :  { %622 = vmatpush.msrb.mxu2 %v563_v28 }
 0x1de   :  { %646 = vmatpush.msrb.mxu3 %v1679_v12 }
 0x1e0   :  { %v540_v22 = vpop.permute.xlu0 %539 }
 0x1e1   :  { %v514_v24 = vpop.permute.xlu1 %513  ;;  %v547_v25 = vsel %vm545_vm9, %v540_v22, %v542_v32  ;;  %v548_v55 = vsel %vm545_vm9, %v538_v3, %v540_v22  ;;  %v533_v32 = vmul.f32 %v525_v43, %v520_v42  ;;  %v505_v22 = vmul.f32 %v497_v6, %v492_v46 }
 0x1e2   :  { %v518_v28 = vsel %vm517_vm10, %v514_v24, %v516_v5  ;;  %v519_v12 = vsel %vm517_vm10, %v512_v1, %v514_v24  ;;  %v561_v14 = vmul.f32 %v553_v41, %v548_v55  ;;  %v562_v47 = vmul.f32 %v554_v20, %v547_v25 }
 0x1e3   :  { %v535_v35 = vmul.f32 %v527_v19, %v518_v28  ;;  %v534_v54 = vmul.f32 %v526_v63, %v519_v12  ;;  %v498_v3 = vperm.slane %v1227_v31, 1  ;;  %v499_v5 = vperm.slane %v1227_v31, 2 }
 0x1e4   :  { %582 = vmatpush.msrb.mxu0 %v561_v14  ;;  %602 = vmatpush.msrb.mxu1 %v562_v47  ;;  %v469_v19 = vperm.slane %v1751_v34, 0  ;;  %v470_v1 = vperm.slane %v1751_v34, 1  ;;  %v471_v31 = vperm.slane %v1751_v34, 2  ;;  %v1794_v14 = vld [vmem:[%s2327_s3 + $0x24] ss:$8 sm:$0xf] }
 0x1e5   :  { %623 = vmatpush.msrb.mxu2 %v535_v35  ;;  %vm405_vm9 = vcmp.lt.s32.totalorder %v1417_v7, 30  ;;  %vm863_vm10 = vcmp.lt.s32.totalorder %v1417_v7, 77 }
 0x1e6   :  { %583 = vmatpush.msrb.mxu0 %v533_v32  ;;  %603 = vmatpush.msrb.mxu1 %v534_v54 }
 0x1e8   :  { %584 = vmatpush.msrb.mxu0 %v505_v22  ;;  %v1775_v24 = vpop.permute.xlu0 %399 }
 0x1e9   :  { %v486_v25 = vpop.permute.xlu1 %485 }
 0x1ea   :  { %v490_v20 = vsel %vm489_vm11, %v486_v25, %v488_v37  ;;  %v491_v42 = vsel %vm489_vm11, %v1724_v4, %v486_v25  ;;  %v374_v37 = vpop.permute.xlu2 %373  ;;  %v1819_v25 = vld [vmem:[%s2327_s3 + $0x21] ss:$8 sm:$0xf]  ;;  %vm835_vm11 = vcmp.lt.s32.totalorder %v1417_v7, 80 }
 0x1eb   :  { %v506_v43 = vmul.f32 %v498_v3, %v491_v42  ;;  %v507_v63 = vmul.f32 %v499_v5, %v490_v20 }
 0x1ed   :  { %604 = vmatpush.msrb.mxu1 %v506_v43  ;;  %624 = vmatpush.msrb.mxu2 %v507_v63  ;;  %v379_v63 = vsel %vm377_vm14, %v1738_v18, %v374_v37 }
 0x1f0   :  { %v456_v2 = vpop.permute.xlu0 %455 }
 0x1f1   :  { %v458_v26 = vpop.permute.xlu1 %457  ;;  %v464_v41 = vsel %vm461_vm12, %v454_v56, %v456_v2  ;;  %v443_v56 = vperm.slane %v1794_v14, 2 }
 0x1f2   :  { %v462_v55 = vsel %vm461_vm12, %v458_v26, %v460_v59  ;;  %v463_v4 = vsel %vm461_vm12, %v456_v2, %v458_v26  ;;  %v477_v6 = vmul.f32 %v469_v19, %v464_v41  ;;  %v444_v59 = vperm.slane %v1794_v14, 3  ;;  %v346_v54 = vpop.permute.xlu2 %345 }
 0x1f3   :  { %v478_v28 = vmul.f32 %v470_v1, %v463_v4  ;;  %v479_v12 = vmul.f32 %v471_v31, %v462_v55  ;;  %v359_v41 = vperm.slane %v1819_v25, 2  ;;  %v351_v55 = vsel %vm349_vm15, %v1746_v33, %v346_v54 }
 0x1f4   :  { %585 = vmatpush.msrb.mxu0 %v477_v6  ;;  %vm807_vm12 = vcmp.lt.s32.totalorder %v1417_v7, 83 }
 0x1f5   :  { %605 = vmatpush.msrb.mxu1 %v478_v28  ;;  %625 = vmatpush.msrb.mxu2 %v479_v12  ;;  %v360_v12 = vperm.slane %v1819_v25, 3 }
 0x1f6   :  { %586 = vmatpush.msrb.mxu0 %v1667_v50 }
 0x1f7   :  { %606 = vmatpush.msrb.mxu1 %v1669_v51  ;;  %626 = vmatpush.msrb.mxu2 %v1685_v13  ;;  %v1224_v51 = vld [vmem:[%s2327_s3 + $0x23] ss:$8 sm:$0xf]  ;;  %v1813_v13 = vld [vmem:[%s2327_s3 + $0x22] ss:$8 sm:$0xf] }
 0x1f8   :  { %v430_v34 = vpop.permute.xlu0 %429  ;;  %v415_v22 = vperm.slane %v1224_v51, 2  ;;  %v416_v3 = vperm.slane %v1224_v51, 3  ;;  %v387_v42 = vperm.slane %v1813_v13, 2  ;;  %v388_v43 = vperm.slane %v1813_v13, 3 }
 0x1f9   :  { %v432_v47 = vpop.permute.xlu1 %431  ;;  %v435_v46 = vsel %vm433_vm13, %v1722_v58, %v430_v34 }
 0x1fa   :  { %v434_v35 = vsel %vm433_vm13, %v430_v34, %v432_v47  ;;  %v451_v50 = vmul.f32 %v443_v56, %v435_v46  ;;  %v395_v4 = vmul.f32 %v387_v42, %v379_v63  ;;  %v398_v28 = vpop.permute.xlu2 %397  ;;  %v367_v56 = vmul.f32 %v359_v41, %v351_v55 }
 0x1fb   :  { %v452_v32 = vmul.f32 %v444_v59, %v434_v35  ;;  %v441_v59 = vperm.slane %v1794_v14, 0  ;;  %v442_v34 = vperm.slane %v1794_v14, 1  ;;  %v408_v35 = vsel %vm405_vm9, %v398_v28, %v1775_v24 }
 0x1fc   :  { %627 = vmatpush.msrb.mxu2 %v451_v50 }
 0x1fd   :  { %647 = vmatpush.msrb.mxu3 %v452_v32 }
 0x200   :  { %v376_v5 = vpop.permute.xlu0 %375 }
 0x201   :  { %v402_v20 = vpop.permute.xlu1 %401  ;;  %v378_v31 = vsel %vm377_vm14, %v374_v37, %v376_v5  ;;  %v565_v37 = vld [vmem:[%s2329_s1 + $0x8] sm:$0xff] }
 0x202   :  { %v406_v19 = vsel %vm405_vm9, %v402_v20, %v1773_v57  ;;  %v407_v1 = vsel %vm405_vm9, %v1775_v24, %v402_v20  ;;  %v396_v6 = vmul.f32 %v388_v43, %v378_v31  ;;  %v409_v20 = vsel %vm405_vm9, %v1773_v57, %v398_v28 }
 0x203   :  { %v423_v2 = vmul.f32 %v415_v22, %v407_v1  ;;  %v424_v26 = vmul.f32 %v416_v3, %v406_v19  ;;  %v413_v22 = vperm.slane %v1224_v51, 0  ;;  %v414_v3 = vperm.slane %v1224_v51, 1 }
 0x204   :  { %v385_v57 = vperm.slane %v1813_v13, 0  ;;  %v386_v19 = vperm.slane %v1813_v13, 1  ;;  %v358_v1 = vperm.slane %v1819_v25, 1  ;;  %vm667_vm9 = vcmp.lt.s32.totalorder %v1417_v7, 51 }
 0x205   :  { %628 = vmatpush.msrb.mxu2 %v423_v2  ;;  %648 = vmatpush.msrb.mxu3 %v424_v26  ;;  %v422_v51 = vmul.f32 %v414_v3, %v408_v35 }
 0x207   :  { %629 = vmatpush.msrb.mxu2 %v395_v4  ;;  %649 = vmatpush.msrb.mxu3 %v396_v6 }
 0x208   :  { %v348_v46 = vpop.permute.xlu0 %347 }
 0x209   :  { %v426_v50 = vpop.permute.xlu1 %425  ;;  %630 = vmatpush.msrb.mxu2 %v367_v56  ;;  %v350_v32 = vsel %vm349_vm15, %v346_v54, %v348_v46  ;;  %v421_v54 = vmul.f32 %v413_v22, %v409_v20  ;;  %v884_v22 = vld [vmem:[%s2328_s2 + $0x10] sm:$0xff] }
 0x20a   :  { %v436_v14 = vsel %vm433_vm13, %v426_v50, %v1722_v58  ;;  %v437_v42 = vsel %vm433_vm13, %v432_v47, %v426_v50  ;;  %1232 = vmatmul.msk.f32.vlgmr.msrb.gmra.mxu2 %vm253_vm8, %v565_v37  ;;  %v368_v24 = vmul.f32 %v360_v12, %v350_v32  ;;  %v357_v47 = vperm.slane %v1819_v25, 0 }
 0x20b   :  { %v449_v43 = vmul.f32 %v441_v59, %v437_v42  ;;  %v450_v63 = vmul.f32 %v442_v34, %v436_v14  ;;  %v1241_v42 = vld [vmem:[%s2327_s3 + $0x62] ss:$8 sm:$0xf]  ;;  %vm779_vm13 = vcmp.lt.s32.totalorder %v1417_v7, 125 }
 0x20c   :  { %650 = vmatpush.msrb.mxu3 %v368_v24  ;;  %v874_v24 = vperm.slane %v1241_v42, 3 }
 0x20d   :  { %587 = vmatpush.msrb.mxu0 %v449_v43  ;;  %607 = vmatpush.msrb.mxu1 %v450_v63 }
 0x20e   :  { %1233 = vmatmul.msk.f32.vlgmr.msrb.gmra.mxu3 %vm253_vm8, %v565_v37 }
 0x20f   :  { %588 = vmatpush.msrb.mxu0 %v421_v54  ;;  %608 = vmatpush.msrb.mxu1 %v422_v51 }
 0x210   :  { %v370_v58 = vpop.permute.xlu0 %369 }
 0x211   :  { %v342_v31 = vpop.permute.xlu1 %341  ;;  %v380_v2 = vsel %vm377_vm14, %v370_v58, %v1738_v18  ;;  %v381_v26 = vsel %vm377_vm14, %v376_v5, %v370_v58  ;;  %v570_v18 = vpop.permute.xlu2 %569  ;;  %vm751_vm14 = vcmp.lt.s32.totalorder %v1417_v7, 3 }
 0x212   :  { %v352_v41 = vsel %vm349_vm15, %v342_v31, %v1746_v33  ;;  %v353_v13 = vsel %vm349_vm15, %v348_v46, %v342_v31  ;;  %v393_v55 = vmul.f32 %v385_v57, %v381_v26  ;;  %v394_v4 = vmul.f32 %v386_v19, %v380_v2  ;;  %v1240_v57 = vld [vmem:[%s2327_s3 + $0x61] ss:$8 sm:$0xf]  ;;  %v1239_v26 = vld [vmem:[%s2327_s3 + $0x60] ss:$8 sm:$0xf] }
 0x213   :  { %v365_v25 = vmul.f32 %v357_v47, %v353_v13  ;;  %v366_v6 = vmul.f32 %v358_v1, %v352_v41  ;;  %v846_v58 = vperm.slane %v1240_v57, 3  ;;  %v818_v13 = vperm.slane %v1239_v26, 3 }
 0x214   :  { %589 = vmatpush.msrb.mxu0 %v393_v55  ;;  %609 = vmatpush.msrb.mxu1 %v394_v4  ;;  %vm695_vm15 = vcmp.lt.s32.totalorder %v1417_v7, 48 }
 0x216   :  { %590 = vmatpush.msrb.mxu0 %v365_v25  ;;  %610 = vmatpush.msrb.mxu1 %v366_v6 }
 0x217   :  { %1230 = vmatmul.msk.f32.vlgmr.msrb.gmra.mxu0 %vm253_vm8, %v565_v37  ;;  %1231 = vmatmul.msk.f32.vlgmr.msrb.gmra.mxu1 %vm253_vm8, %v565_v37 }
 0x28d   :  { %v632_v35 = vpop.f32.mrf.mxu2 }
 0x28e   :  { %v633_v50 = vadd.f32 %v632_v35, %v570_v18 }
 0x290   :  { %v1895_v32 = vmax.f32 %v633_v50, 0.0 }
 0x291   :  { %v652_v37 = vpop.f32.mrf.mxu3 }
 0x292   :  { %v653_v34 = vadd.f32 %v652_v37, %v570_v18 }
 0x294   :  { %v592_v5 = vpop.f32.mrf.mxu0  ;;  %v612_v28 = vpop.f32.mrf.mxu1  ;;  %v1889_v46 = vmax.f32 %v653_v34, 0.0 }
 0x295   :  { %v593_v12 = vadd.f32 %v592_v5, %v570_v18  ;;  %v613_v33 = vadd.f32 %v612_v28, %v570_v18  ;;  %v1961_v18 = vld [vmem:[%s2327_s3 + $0x47] ss:$8 sm:$0xf]  ;;  %v873_v28 = vperm.slane %v1241_v42, 2 }
 0x296   :  { %v790_v5 = vperm.slane %v1961_v18, 3 }
 0x297   :  { %v1877_v56 = vmax.f32 %v593_v12, 0.0  ;;  %v1879_v59 = vmax.f32 %v613_v33, 0.0 }
 0x299   :  { %855 = vrot.lane.b32.xlu0 %v1877_v56, %s1298_s17  ;;  %745 = vrot.lane.b32.xlu2 %v1879_v59, %s1299_s18 }
 0x29a   :  { %829 = vrot.lane.b32.xlu1 %v1879_v59, %s1300_s19 }
 0x2a1   :  { %827 = vrot.lane.b32.xlu0 %v1877_v56, %s1300_s19  ;;  %801 = vrot.lane.b32.xlu2 %v1879_v59, %s1301_s20 }
 0x2a2   :  { %689 = vrot.lane.b32.xlu1 %v1879_v59, %s1302_s25 }
 0x2a9   :  { %799 = vrot.lane.b32.xlu0 %v1877_v56, %s1301_s20  ;;  %861 = vrot.lane.b32.xlu2 %v1889_v46, %s1298_s17 }
 0x2aa   :  { %661 = vrot.lane.b32.xlu1 %v1879_v59, %s1303_s26 }
 0x2b1   :  { %771 = vrot.lane.b32.xlu0 %v1877_v56, %s1304_s5  ;;  %833 = vrot.lane.b32.xlu2 %v1889_v46, %s1300_s19 }
 0x2b2   :  { %859 = vrot.lane.b32.xlu1 %v1895_v32, %s1298_s17 }
 0x2b9   :  { %805 = vrot.lane.b32.xlu2 %v1889_v46, %s1301_s20  ;;  %857 = vrot.lane.b32.xlu0 %v1879_v59, %s1298_s17 }
 0x2ba   :  { %831 = vrot.lane.b32.xlu1 %v1895_v32, %s1300_s19 }
 0x2c1   :  { %777 = vrot.lane.b32.xlu2 %v1889_v46, %s1304_s5  ;;  %717 = vrot.lane.b32.xlu0 %v1879_v59, %s1305_s6 }
 0x2c2   :  { %803 = vrot.lane.b32.xlu1 %v1895_v32, %s1301_s20 }
 0x2c9   :  { %721 = vrot.lane.b32.xlu2 %v1889_v46, %s1305_s6  ;;  %773 = vrot.lane.b32.xlu0 %v1879_v59, %s1304_s5 }
 0x2ca   :  { %775 = vrot.lane.b32.xlu1 %v1895_v32, %s1304_s5 }
 0x2d1   :  { %691 = vrot.lane.b32.xlu2 %v1895_v32, %s1302_s25  ;;  %747 = vrot.lane.b32.xlu0 %v1895_v32, %s1299_s18 }
 0x2d2   :  { %749 = vrot.lane.b32.xlu1 %v1889_v46, %s1299_s18 }
 0x2d9   :  { %663 = vrot.lane.b32.xlu2 %v1895_v32, %s1303_s26  ;;  %693 = vrot.lane.b32.xlu0 %v1889_v46, %s1302_s25 }
 0x2da   :  { %719 = vrot.lane.b32.xlu1 %v1895_v32, %s1305_s6 }
 0x2e1   :  { %715 = vrot.lane.b32.xlu2 %v1877_v56, %s1305_s6  ;;  %665 = vrot.lane.b32.xlu0 %v1889_v46, %s1303_s26 }
 0x2e2   :  { %743 = vrot.lane.b32.xlu1 %v1877_v56, %s1299_s18 }
 0x2e9   :  { %887 = vperm.xlu2 %1275, %v884_v22   ;;  %687 = vrot.lane.b32.xlu0 %v1877_v56, %s1302_s25 }
 0x2ea   :  { %659 = vrot.lane.b32.xlu1 %v1877_v56, %s1303_s26 }
 0x2f3   :  { %v1932_v3 = vpop.permute.xlu2 %745 }
 0x2fb   :  { %v1934_v20 = vpop.permute.xlu2 %801 }
 0x303   :  { %v862_v14 = vpop.permute.xlu2 %861 }
 0x30b   :  { %v856_v43 = vpop.permute.xlu0 %855  ;;  %v834_v19 = vpop.permute.xlu2 %833 }
 0x30c   :  { %v867_v63 = vsel %vm863_vm10, %v862_v14, %v856_v43  ;;  %v830_v54 = vpop.permute.xlu1 %829 }
 0x30d   :  { %v882_v51 = vmul.f32 %v874_v24, %v867_v63  ;;  %v871_v24 = vperm.slane %v1241_v42, 0  ;;  %v845_v63 = vperm.slane %v1240_v57, 2 }
 0x30f   :  { %960 = vmatpush.msra.mxu3 %v882_v51  ;;  %v872_v51 = vperm.slane %v1241_v42, 1 }
 0x313   :  { %v828_v47 = vpop.permute.xlu0 %827  ;;  %v806_v41 = vpop.permute.xlu2 %805 }
 0x314   :  { %v839_v1 = vsel %vm835_vm11, %v834_v19, %v828_v47  ;;  %v1948_v31 = vpop.permute.xlu1 %689 }
 0x315   :  { %v854_v2 = vmul.f32 %v846_v58, %v839_v1  ;;  %v843_v58 = vperm.slane %v1240_v57, 0 }
 0x317   :  { %961 = vmatpush.msra.mxu3 %v854_v2  ;;  %v838_v2 = vsel %vm835_vm11, %v828_v47, %v830_v54 }
 0x31b   :  { %v800_v55 = vpop.permute.xlu0 %799  ;;  %v778_v12 = vpop.permute.xlu2 %777 }
 0x31c   :  { %v811_v4 = vsel %vm807_vm12, %v806_v41, %v800_v55  ;;  %v1956_v25 = vpop.permute.xlu1 %661  ;;  %v810_v47 = vsel %vm807_vm12, %v800_v55, %v1934_v20 }
 0x31d   :  { %v826_v6 = vmul.f32 %v818_v13, %v811_v4  ;;  %v844_v13 = vperm.slane %v1240_v57, 1 }
 0x31f   :  { %962 = vmatpush.msra.mxu3 %v826_v6 }
 0x323   :  { %v772_v33 = vpop.permute.xlu0 %771 }
 0x324   :  { %v783_v37 = vsel %vm779_vm13, %v778_v12, %v772_v33  ;;  %v860_v34 = vpop.permute.xlu1 %859 }
 0x325   :  { %v798_v35 = vmul.f32 %v790_v5, %v783_v37  ;;  %v864_v50 = vsel %vm863_vm10, %v860_v34, %v862_v14  ;;  %v815_v5 = vperm.slane %v1239_v26, 0 }
 0x326   :  { %v881_v22 = vmul.f32 %v873_v28, %v864_v50  ;;  %v816_v50 = vperm.slane %v1239_v26, 1 }
 0x327   :  { %963 = vmatpush.msra.mxu3 %v798_v35  ;;  %v851_v35 = vmul.f32 %v843_v58, %v838_v2  ;;  %v788_v2 = vperm.slane %v1961_v18, 1 }
 0x328   :  { %940 = vmatpush.msra.mxu2 %v881_v22  ;;  %v1983_v22 = vpop.permute.xlu2 %721 }
 0x329   :  { %964 = vmatpush.msra.mxu3 %v1889_v46 }
 0x32b   :  { %v858_v1 = vpop.permute.xlu0 %857 }
 0x32c   :  { %v832_v4 = vpop.permute.xlu1 %831  ;;  %v865_v6 = vsel %vm863_vm10, %v858_v1, %v860_v34  ;;  %v866_v14 = vsel %vm863_vm10, %v856_v43, %v858_v1  ;;  %v823_v43 = vmul.f32 %v815_v5, %v810_v47  ;;  %v789_v1 = vperm.slane %v1961_v18, 2 }
 0x32d   :  { %v836_v46 = vsel %vm835_vm11, %v832_v4, %v834_v19  ;;  %v837_v42 = vsel %vm835_vm11, %v830_v54, %v832_v4  ;;  %v879_v28 = vmul.f32 %v871_v24, %v866_v14  ;;  %v880_v37 = vmul.f32 %v872_v51, %v865_v6 }
 0x32e   :  { %v853_v57 = vmul.f32 %v845_v63, %v836_v46  ;;  %v852_v34 = vmul.f32 %v844_v13, %v837_v42  ;;  %v817_v19 = vperm.slane %v1239_v26, 2  ;;  %v787_v26 = vperm.slane %v1961_v18, 0 }
 0x32f   :  { %900 = vmatpush.msra.mxu0 %v879_v28  ;;  %920 = vmatpush.msra.mxu1 %v880_v37  ;;  %v2004_v28 = vld [vmem:[%s2327_s3 + $0x45] ss:$8 sm:$0xf]  ;;  %vm723_vm10 = vcmp.lt.s32.totalorder %v1417_v7, 45 }
 0x330   :  { %941 = vmatpush.msra.mxu2 %v853_v57  ;;  %v761_v18 = vperm.slane %v2004_v28, 2 }
 0x331   :  { %901 = vmatpush.msra.mxu0 %v851_v35  ;;  %921 = vmatpush.msra.mxu1 %v852_v34 }
 0x333   :  { %902 = vmatpush.msra.mxu0 %v823_v43  ;;  %v1985_v54 = vpop.permute.xlu0 %717 }
 0x334   :  { %v804_v24 = vpop.permute.xlu1 %803 }
 0x335   :  { %v808_v55 = vsel %vm807_vm12, %v804_v24, %v806_v41  ;;  %v809_v63 = vsel %vm807_vm12, %v1934_v20, %v804_v24  ;;  %v692_v41 = vpop.permute.xlu2 %691 }
 0x336   :  { %v824_v51 = vmul.f32 %v816_v50, %v809_v63  ;;  %v825_v58 = vmul.f32 %v817_v19, %v808_v55  ;;  %v2029_v19 = vld [vmem:[%s2327_s3 + $0x42] ss:$8 sm:$0xf] }
 0x338   :  { %922 = vmatpush.msra.mxu1 %v824_v51  ;;  %942 = vmatpush.msra.mxu2 %v825_v58  ;;  %v697_v58 = vsel %vm695_vm15, %v1948_v31, %v692_v41 }
 0x33b   :  { %v774_v13 = vpop.permute.xlu0 %773 }
 0x33c   :  { %v776_v4 = vpop.permute.xlu1 %775  ;;  %v782_v6 = vsel %vm779_vm13, %v772_v33, %v774_v13 }
 0x33d   :  { %v780_v14 = vsel %vm779_vm13, %v776_v4, %v778_v12  ;;  %v781_v20 = vsel %vm779_vm13, %v774_v13, %v776_v4  ;;  %v795_v46 = vmul.f32 %v787_v26, %v782_v6  ;;  %v762_v12 = vperm.slane %v2004_v28, 3  ;;  %v664_v43 = vpop.permute.xlu2 %663 }
 0x33e   :  { %v797_v5 = vmul.f32 %v789_v1, %v780_v14  ;;  %v796_v42 = vmul.f32 %v788_v2, %v781_v20  ;;  %v677_v13 = vperm.slane %v2029_v19, 2  ;;  %v669_v14 = vsel %vm667_vm9, %v1956_v25, %v664_v43 }
 0x33f   :  { %903 = vmatpush.msra.mxu0 %v795_v46 }
 0x340   :  { %923 = vmatpush.msra.mxu1 %v796_v42  ;;  %943 = vmatpush.msra.mxu2 %v797_v5  ;;  %v678_v42 = vperm.slane %v2029_v19, 3 }
 0x341   :  { %904 = vmatpush.msra.mxu0 %v1877_v56  ;;  %v2020_v56 = vld [vmem:[%s2327_s3 + $0x43] ss:$8 sm:$0xf] }
 0x342   :  { %924 = vmatpush.msra.mxu1 %v1879_v59  ;;  %944 = vmatpush.msra.mxu2 %v1895_v32  ;;  %v1236_v59 = vld [vmem:[%s2327_s3 + $0x44] ss:$8 sm:$0xf]  ;;  %v705_v55 = vperm.slane %v2020_v56, 2  ;;  %v706_v51 = vperm.slane %v2020_v56, 3 }
 0x343   :  { %v748_v33 = vpop.permute.xlu0 %747  ;;  %v733_v32 = vperm.slane %v1236_v59, 2  ;;  %v734_v50 = vperm.slane %v1236_v59, 3 }
 0x344   :  { %v750_v47 = vpop.permute.xlu1 %749  ;;  %v753_v57 = vsel %vm751_vm14, %v1932_v3, %v748_v33  ;;  %v713_v20 = vmul.f32 %v705_v55, %v697_v58 }
 0x345   :  { %v752_v37 = vsel %vm751_vm14, %v748_v33, %v750_v47  ;;  %v769_v35 = vmul.f32 %v761_v18, %v753_v57  ;;  %v716_v46 = vpop.permute.xlu2 %715  ;;  %v685_v18 = vmul.f32 %v677_v13, %v669_v14  ;;  %v883_v33 = vld [vmem:[%s2329_s1 + $0x10] sm:$0xff] }
 0x346   :  { %v770_v34 = vmul.f32 %v762_v12, %v752_v37  ;;  %v760_v12 = vperm.slane %v2004_v28, 1  ;;  %v731_v37 = vperm.slane %v1236_v59, 0 }
 0x347   :  { %945 = vmatpush.msra.mxu2 %v769_v35  ;;  %v732_v35 = vperm.slane %v1236_v59, 1 }
 0x348   :  { %965 = vmatpush.msra.mxu3 %v770_v34  ;;  %v726_v34 = vsel %vm723_vm10, %v716_v46, %v1985_v54 }
 0x34b   :  { %v694_v24 = vpop.permute.xlu0 %693 }
 0x34c   :  { %v720_v63 = vpop.permute.xlu1 %719  ;;  %v696_v2 = vsel %vm695_vm15, %v692_v41, %v694_v24  ;;  %v759_v41 = vperm.slane %v2004_v28, 0  ;;  %v727_v28 = vsel %vm723_vm10, %v1983_v22, %v716_v46 }
 0x34d   :  { %v724_v1 = vsel %vm723_vm10, %v720_v63, %v1983_v22  ;;  %v725_v26 = vsel %vm723_vm10, %v1985_v54, %v720_v63  ;;  %v714_v5 = vmul.f32 %v706_v51, %v696_v2  ;;  %v739_v58 = vmul.f32 %v731_v37, %v727_v28 }
 0x34e   :  { %v741_v4 = vmul.f32 %v733_v32, %v725_v26  ;;  %v742_v6 = vmul.f32 %v734_v50, %v724_v1  ;;  %v740_v1 = vmul.f32 %v732_v35, %v726_v34  ;;  %v703_v22 = vperm.slane %v2020_v56, 0 }
 0x350   :  { %946 = vmatpush.msra.mxu2 %v741_v4  ;;  %966 = vmatpush.msra.mxu3 %v742_v6 }
 0x352   :  { %947 = vmatpush.msra.mxu2 %v713_v20  ;;  %967 = vmatpush.msra.mxu3 %v714_v5 }
 0x353   :  { %v666_v57 = vpop.permute.xlu0 %665 }
 0x354   :  { %v744_v32 = vpop.permute.xlu1 %743  ;;  %948 = vmatpush.msra.mxu2 %v685_v18  ;;  %v668_v50 = vsel %vm667_vm9, %v664_v43, %v666_v57  ;;  %v704_v43 = vperm.slane %v2020_v56, 1 }
 0x355   :  { %v754_v55 = vsel %vm751_vm14, %v744_v32, %v1932_v3  ;;  %v755_v59 = vsel %vm751_vm14, %v750_v47, %v744_v32  ;;  %v686_v63 = vmul.f32 %v678_v42, %v668_v50  ;;  %1244 = vmatmul.msk.f32.vlgmr.msra.gmra.mxu2 %vm253_vm8, %v883_v33  ;;  %v675_v3 = vperm.slane %v2029_v19, 0  ;;  %v1106_v32 = vld [vmem:[%s2328_s2 + $0x18] sm:$0xff] }
 0x356   :  { %v767_v54 = vmul.f32 %v759_v41, %v755_v59  ;;  %v768_v51 = vmul.f32 %v760_v12, %v754_v55  ;;  %v676_v47 = vperm.slane %v2029_v19, 1 }
 0x357   :  { %968 = vmatpush.msra.mxu3 %v686_v63 }
 0x358   :  { %905 = vmatpush.msra.mxu0 %v767_v54  ;;  %925 = vmatpush.msra.mxu1 %v768_v51 }
 0x359   :  { %1245 = vmatmul.msk.f32.vlgmr.msra.gmra.mxu3 %vm253_vm8, %v883_v33 }
 0x35a   :  { %906 = vmatpush.msra.mxu0 %v739_v58  ;;  %926 = vmatpush.msra.mxu1 %v740_v1 }
 0x35b   :  { %v688_v26 = vpop.permute.xlu0 %687 }
 0x35c   :  { %v660_v2 = vpop.permute.xlu1 %659  ;;  %v698_v13 = vsel %vm695_vm15, %v688_v26, %v1948_v31  ;;  %v699_v4 = vsel %vm695_vm15, %v694_v24, %v688_v26  ;;  %v888_v31 = vpop.permute.xlu2 %887 }
 0x35d   :  { %v670_v6 = vsel %vm667_vm9, %v660_v2, %v1956_v25  ;;  %v671_v56 = vsel %vm667_vm9, %v666_v57, %v660_v2  ;;  %v711_v14 = vmul.f32 %v703_v22, %v699_v4  ;;  %v712_v20 = vmul.f32 %v704_v43, %v698_v13 }
 0x35e   :  { %v683_v5 = vmul.f32 %v675_v3, %v671_v56  ;;  %v684_v19 = vmul.f32 %v676_v47, %v670_v6 }
 0x35f   :  { %907 = vmatpush.msra.mxu0 %v711_v14  ;;  %927 = vmatpush.msra.mxu1 %v712_v20 }
 0x361   :  { %908 = vmatpush.msra.mxu0 %v683_v5  ;;  %928 = vmatpush.msra.mxu1 %v684_v19 }
 0x362   :  { %1242 = vmatmul.msk.f32.vlgmr.msra.gmra.mxu0 %vm253_vm8, %v883_v33  ;;  %1243 = vmatmul.msk.f32.vlgmr.msra.gmra.mxu1 %vm253_vm8, %v883_v33 }
 0x3d8   :  { %v950_v37 = vpop.f32.mrf.mxu2 }
 0x3d9   :  { %v951_v35 = vadd.f32 %v950_v37, %v888_v31 }
 0x3db   :  { %v2108_v34 = vmax.f32 %v951_v35, 0.0 }
 0x3dc   :  { %v970_v12 = vpop.f32.mrf.mxu3 }
 0x3dd   :  { %v971_v33 = vadd.f32 %v970_v12, %v888_v31 }
 0x3df   :  { %v910_v24 = vpop.f32.mrf.mxu0  ;;  %v930_v46 = vpop.f32.mrf.mxu1  ;;  %v976_v57 = vmax.f32 %v971_v33, 0.0 }
 0x3e0   :  { %v911_v42 = vadd.f32 %v910_v24, %v888_v31  ;;  %v931_v25 = vadd.f32 %v930_v46, %v888_v31 }
 0x3e2   :  { %v2087_v18 = vmax.f32 %v911_v42, 0.0  ;;  %v2089_v41 = vmax.f32 %v931_v25, 0.0 }
 0x3e4   :  { %1089 = vrot.lane.b32.xlu0 %v2087_v18, %s1281_s21  ;;  %1027 = vrot.lane.b32.xlu2 %v2089_v41, %s1285_s27 }
 0x3e5   :  { %1075 = vrot.lane.b32.xlu1 %v2089_v41, %s1282_s22 }
 0x3ec   :  { %1073 = vrot.lane.b32.xlu0 %v2087_v18, %s1282_s22  ;;  %1059 = vrot.lane.b32.xlu2 %v2089_v41, %s1283_s23 }
 0x3ed   :  { %995 = vrot.lane.b32.xlu1 %v2089_v41, %s1287_s29 }
 0x3f4   :  { %1057 = vrot.lane.b32.xlu0 %v2087_v18, %s1283_s23  ;;  %1095 = vrot.lane.b32.xlu2 %v976_v57, %s1281_s21 }
 0x3f5   :  { %979 = vrot.lane.b32.xlu1 %v2089_v41, %s1288_s30 }
 0x3fc   :  { %1041 = vrot.lane.b32.xlu0 %v2087_v18, %s1284_s24  ;;  %1079 = vrot.lane.b32.xlu2 %v976_v57, %s1282_s22 }
 0x3fd   :  { %1093 = vrot.lane.b32.xlu1 %v2108_v34, %s1281_s21 }
 0x404   :  { %1063 = vrot.lane.b32.xlu2 %v976_v57, %s1283_s23  ;;  %1091 = vrot.lane.b32.xlu0 %v2089_v41, %s1281_s21 }
 0x405   :  { %1077 = vrot.lane.b32.xlu1 %v2108_v34, %s1282_s22 }
 0x40c   :  { %1047 = vrot.lane.b32.xlu2 %v976_v57, %s1284_s24  ;;  %1011 = vrot.lane.b32.xlu0 %v2089_v41, %s1286_s28 }
 0x40d   :  { %1061 = vrot.lane.b32.xlu1 %v2108_v34, %s1283_s23 }
 0x414   :  { %1015 = vrot.lane.b32.xlu2 %v976_v57, %s1286_s28  ;;  %1043 = vrot.lane.b32.xlu0 %v2089_v41, %s1284_s24 }
 0x415   :  { %1045 = vrot.lane.b32.xlu1 %v2108_v34, %s1284_s24 }
 0x41c   :  { %997 = vrot.lane.b32.xlu2 %v2108_v34, %s1287_s29  ;;  %1029 = vrot.lane.b32.xlu0 %v2108_v34, %s1285_s27 }
 0x41d   :  { %1031 = vrot.lane.b32.xlu1 %v976_v57, %s1285_s27 }
 0x424   :  { %981 = vrot.lane.b32.xlu2 %v2108_v34, %s1288_s30  ;;  %999 = vrot.lane.b32.xlu0 %v976_v57, %s1287_s29 }
 0x425   :  { %1013 = vrot.lane.b32.xlu1 %v2108_v34, %s1286_s28 }
 0x42c   :  { %1009 = vrot.lane.b32.xlu2 %v2087_v18, %s1286_s28  ;;  %983 = vrot.lane.b32.xlu0 %v976_v57, %s1288_s30 }
 0x42d   :  { %1025 = vrot.lane.b32.xlu1 %v2087_v18, %s1285_s27 }
 0x434   :  { %1109 = vperm.xlu2 %1275, %v1106_v32   ;;  %993 = vrot.lane.b32.xlu0 %v2087_v18, %s1287_s29 }
 0x435   :  { %977 = vrot.lane.b32.xlu1 %v2087_v18, %s1288_s30 }
 0x43e   :  { %v2152_v50 = vpop.permute.xlu2 %1027 }
 0x446   :  { %v1060_v28 = vpop.permute.xlu2 %1059 }
 0x44e   :  { %v1096_v55 = vpop.permute.xlu2 %1095 }
 0x456   :  { %v1090_v59 = vpop.permute.xlu0 %1089  ;;  %v1080_v58 = vpop.permute.xlu2 %1079 }
 0x457   :  { %v1100_v63 = vsel %vm226_vm0, %v1096_v55, %v1090_v59  ;;  %v1076_v54 = vpop.permute.xlu1 %1075 }
 0x458   :  { %v1104_v51 = vmul.f32 %v1100_v63, %v237_v9 }
 0x45a   :  { %1182 = vmatpush.msrb.mxu3 %v1104_v51 }
 0x45e   :  { %v1074_v1 = vpop.permute.xlu0 %1073  ;;  %v1064_v47 = vpop.permute.xlu2 %1063 }
 0x45f   :  { %v1084_v22 = vsel %vm198_vm1, %v1080_v58, %v1074_v1  ;;  %v2160_v43 = vpop.permute.xlu1 %995  ;;  %v1083_v19 = vsel %vm198_vm1, %v1074_v1, %v1076_v54 }
 0x460   :  { %v1088_v3 = vmul.f32 %v1084_v22, %v209_v16 }
 0x462   :  { %1183 = vmatpush.msrb.mxu3 %v1088_v3 }
 0x466   :  { %v1058_v26 = vpop.permute.xlu0 %1057  ;;  %v1048_v4 = vpop.permute.xlu2 %1047 }
 0x467   :  { %v1068_v2 = vsel %vm170_vm2, %v1064_v47, %v1058_v26  ;;  %v2166_v13 = vpop.permute.xlu1 %979  ;;  %v1067_v25 = vsel %vm170_vm2, %v1058_v26, %v1060_v28 }
 0x468   :  { %v1072_v9 = vmul.f32 %v1068_v2, %v181_v30 }
 0x46a   :  { %1184 = vmatpush.msrb.mxu3 %v1072_v9  ;;  %v2347_v9 = vperm.slane %v1567_v36, 2 }
 0x46e   :  { %v1042_v6 = vpop.permute.xlu0 %1041  ;;  %v1016_v35 = vpop.permute.xlu2 %1015 }
 0x46f   :  { %v1052_v56 = vsel %vm142_vm3, %v1048_v4, %v1042_v6  ;;  %v1094_v14 = vpop.permute.xlu1 %1093 }
 0x470   :  { %v1056_v16 = vmul.f32 %v1052_v56, %v153_v40  ;;  %v1097_v20 = vsel %vm226_vm0, %v1094_v14, %v1096_v55 }
 0x471   :  { %v1103_v5 = vmul.f32 %v1097_v20, %v236_v17 }
 0x472   :  { %1185 = vmatpush.msrb.mxu3 %v1056_v16  ;;  %v2349_v16 = vperm.slane %v1596_v62, 2 }
 0x473   :  { %1162 = vmatpush.msrb.mxu2 %v1103_v5  ;;  %v1105_v5 = vld [vmem:[%s2329_s1 + $0x18] sm:$0xff] }
 0x474   :  { %1186 = vmatpush.msrb.mxu3 %v976_v57  ;;  %v1085_v57 = vmul.f32 %v1083_v19, %v206_v52 }
 0x476   :  { %v1092_v30 = vpop.permute.xlu0 %1091 }
 0x477   :  { %v1078_v31 = vpop.permute.xlu1 %1077  ;;  %v1098_v24 = vsel %vm226_vm0, %v1092_v30, %v1094_v14  ;;  %v1099_v40 = vsel %vm226_vm0, %v1090_v59, %v1092_v30  ;;  %v998_v59 = vpop.permute.xlu2 %997 }
 0x478   :  { %v1081_v46 = vsel %vm198_vm1, %v1078_v31, %v1080_v58  ;;  %v1082_v17 = vsel %vm198_vm1, %v1076_v54, %v1078_v31  ;;  %v1101_v42 = vmul.f32 %v1099_v40, %v234_v48  ;;  %v1102_v33 = vmul.f32 %v1098_v24, %v235_v49 }
 0x479   :  { %v1087_v12 = vmul.f32 %v1081_v46, %v208_v21  ;;  %v1086_v37 = vmul.f32 %v1082_v17, %v207_v53  ;;  %v1069_v48 = vmul.f32 %v1067_v25, %v178_v60  ;;  %v1002_v58 = vsel %vm58_vm6, %v2160_v43, %v998_v59 }
 0x47a   :  { %1122 = vmatpush.msrb.mxu0 %v1101_v42  ;;  %1142 = vmatpush.msrb.mxu1 %v1102_v33  ;;  %v2350_v42 = vperm.slane %v1596_v62, 3 }
 0x47b   :  { %1163 = vmatpush.msrb.mxu2 %v1087_v12  ;;  %v2351_v12 = vperm.slane %v1520_v0, 0 }
 0x47c   :  { %1123 = vmatpush.msrb.mxu0 %v1085_v57  ;;  %1143 = vmatpush.msrb.mxu1 %v1086_v37  ;;  %v2352_v57 = vperm.slane %v1520_v0, 1 }
 0x47e   :  { %1124 = vmatpush.msrb.mxu0 %v1069_v48  ;;  %v1012_v21 = vpop.permute.xlu0 %1011  ;;  %v2353_v48 = vperm.slane %v1550_v23, 0 }
 0x47f   :  { %v1062_v32 = vpop.permute.xlu1 %1061 }
 0x480   :  { %v1065_v8 = vsel %vm170_vm2, %v1062_v32, %v1064_v47  ;;  %v1066_v49 = vsel %vm170_vm2, %v1060_v28, %v1062_v32  ;;  %v2346_v47 = vperm.slane %v1550_v23, 3 }
 0x481   :  { %v1070_v15 = vmul.f32 %v1066_v49, %v179_v61  ;;  %v1071_v52 = vmul.f32 %v1065_v8, %v180_v29 }
 0x483   :  { %1144 = vmatpush.msrb.mxu1 %v1070_v15  ;;  %1164 = vmatpush.msrb.mxu2 %v1071_v52  ;;  %v2355_v52 = vperm.slane %v1567_v36, 0 }
 0x486   :  { %v1044_v53 = vpop.permute.xlu0 %1043 }
 0x487   :  { %v1046_v60 = vpop.permute.xlu1 %1045  ;;  %v1051_v55 = vsel %vm142_vm3, %v1042_v6, %v1044_v53  ;;  %v2348_v6 = vperm.slane %v1567_v36, 3 }
 0x488   :  { %v1049_v63 = vsel %vm142_vm3, %v1046_v60, %v1048_v4  ;;  %v1050_v28 = vsel %vm142_vm3, %v1044_v53, %v1046_v60  ;;  %v1053_v27 = vmul.f32 %v1051_v55, %v150_v44  ;;  %v1007_v4 = vmul.f32 %v1002_v58, %v2347_v9 }
 0x489   :  { %v1055_v61 = vmul.f32 %v1049_v63, %v152_v39  ;;  %v1054_v29 = vmul.f32 %v1050_v28, %v151_v45  ;;  %v2356_v60 = vperm.slane %v1567_v36, 1 }
 0x48a   :  { %1125 = vmatpush.msrb.mxu0 %v1053_v27 }
 0x48b   :  { %1145 = vmatpush.msrb.mxu1 %v1054_v29  ;;  %1165 = vmatpush.msrb.mxu2 %v1055_v61  ;;  %v1277_v29 = vld [vmem:[%s2326_s0 + $0x10] sm:$0xff] }
 0x48c   :  { %1126 = vmatpush.msrb.mxu0 %v2087_v18  ;;  %v982_v18 = vpop.permute.xlu2 %981 }
 0x48d   :  { %1146 = vmatpush.msrb.mxu1 %v2089_v41  ;;  %1166 = vmatpush.msrb.mxu2 %v2108_v34  ;;  %v986_v2 = vsel %vm31_vm7, %v2166_v13, %v982_v18 }
 0x48e   :  { %v1030_v54 = vpop.permute.xlu0 %1029  ;;  %v991_v20 = vmul.f32 %v986_v2, %v2349_v16 }
 0x48f   :  { %v1032_v51 = vpop.permute.xlu1 %1031  ;;  %v1034_v39 = vsel %vm114_vm4, %v2152_v50, %v1030_v54 }
 0x490   :  { %v1033_v44 = vsel %vm114_vm4, %v1030_v54, %v1032_v51  ;;  %v1039_v38 = vmul.f32 %v1034_v39, %v124_v10 }
 0x491   :  { %v1040_v45 = vmul.f32 %v1033_v44, %v125_v11  ;;  %v2345_v11 = vperm.slane %v1550_v23, 2 }
 0x492   :  { %1167 = vmatpush.msrb.mxu2 %v1039_v38 }
 0x493   :  { %1187 = vmatpush.msrb.mxu3 %v1040_v45 }
 0x494   :  { %v1010_v14 = vpop.permute.xlu2 %1009 }
 0x495   :  { %v1019_v19 = vsel %vm86_vm5, %v1010_v14, %v1012_v21  ;;  %v1020_v40 = vsel %vm86_vm5, %v1016_v35, %v1010_v14 }
 0x496   :  { %v1000_v41 = vpop.permute.xlu0 %999 }
 0x497   :  { %v1014_v34 = vpop.permute.xlu1 %1013  ;;  %v1001_v10 = vsel %vm58_vm6, %v998_v59, %v1000_v41  ;;  %v2357_v59 = vperm.slane %v1596_v62, 0 }
 0x498   :  { %v1017_v1 = vsel %vm86_vm5, %v1014_v34, %v1016_v35  ;;  %v1018_v22 = vsel %vm86_vm5, %v1012_v21, %v1014_v34  ;;  %v1008_v56 = vmul.f32 %v1001_v10, %v2348_v6  ;;  %v1021_v35 = vmul.f32 %v1020_v40, %v2353_v48  ;;  %v1280_v10 = vld [vmem:[%s2326_s0 + $0x8] sm:$0xff] }
 0x499   :  { %v1023_v3 = vmul.f32 %v1018_v22, %v2345_v11  ;;  %v1024_v26 = vmul.f32 %v1017_v1, %v2346_v47  ;;  %v1279_v1 = vld [vmem:[%s2326_s0] sm:$0xff] }
 0x49b   :  { %1168 = vmatpush.msrb.mxu2 %v1023_v3  ;;  %1188 = vmatpush.msrb.mxu3 %v1024_v26 }
 0x49c   :  { %v1110_v7 = vpop.permute.xlu2 %1109 }
 0x49d   :  { %1169 = vmatpush.msrb.mxu2 %v1007_v4  ;;  %1189 = vmatpush.msrb.mxu3 %v1008_v56 }
 0x49e   :  { %v984_v30 = vpop.permute.xlu0 %983 }
 0x49f   :  { %v1026_v31 = vpop.permute.xlu1 %1025  ;;  %1170 = vmatpush.msrb.mxu2 %v991_v20  ;;  %v985_v24 = vsel %vm31_vm7, %v982_v18, %v984_v30  ;;  %v1278_v18 = vld [vmem:[%s2326_s0 + $0x18] sm:$0xff] }
 0x4a0   :  { %v1035_v46 = vsel %vm114_vm4, %v1026_v31, %v2152_v50  ;;  %v1036_v17 = vsel %vm114_vm4, %v1032_v51, %v1026_v31  ;;  %v992_v25 = vmul.f32 %v985_v24, %v2350_v42  ;;  %1248 = vmatmul.msk.f32.vlgmr.msrb.gmra.mxu2 %vm253_vm8, %v1105_v5  ;;  %v2354_v50 = vperm.slane %v1550_v23, 1 }
 0x4a1   :  { %v1037_v33 = vmul.f32 %v1036_v17, %v2351_v12  ;;  %v1038_v37 = vmul.f32 %v1035_v46, %v2352_v57 }
 0x4a2   :  { %1190 = vmatpush.msrb.mxu3 %v992_v25  ;;  %v1022_v21 = vmul.f32 %v1019_v19, %v2354_v50 }
 0x4a3   :  { %1127 = vmatpush.msrb.mxu0 %v1037_v33  ;;  %1147 = vmatpush.msrb.mxu1 %v1038_v37 }
 0x4a4   :  { %1249 = vmatmul.msk.f32.vlgmr.msrb.gmra.mxu3 %vm253_vm8, %v1105_v5 }
 0x4a5   :  { %1128 = vmatpush.msrb.mxu0 %v1021_v35  ;;  %1148 = vmatpush.msrb.mxu1 %v1022_v21 }
 0x4a6   :  { %v994_v32 = vpop.permute.xlu0 %993 }
 0x4a7   :  { %v978_v8 = vpop.permute.xlu1 %977  ;;  %v1003_v0 = vsel %vm58_vm6, %v994_v32, %v2160_v43  ;;  %v1004_v49 = vsel %vm58_vm6, %v1000_v41, %v994_v32  ;;  %v2358_v43 = vperm.slane %v1596_v62, 1 }
 0x4a8   :  { %v987_v23 = vsel %vm31_vm7, %v978_v8, %v2166_v13  ;;  %v988_v15 = vsel %vm31_vm7, %v984_v30, %v978_v8  ;;  %v1005_v53 = vmul.f32 %v1004_v49, %v2355_v52  ;;  %v1006_v55 = vmul.f32 %v1003_v0, %v2356_v60 }
 0x4a9   :  { %v989_v63 = vmul.f32 %v988_v15, %v2357_v59  ;;  %v990_v28 = vmul.f32 %v987_v23, %v2358_v43 }
 0x4aa   :  { %1129 = vmatpush.msrb.mxu0 %v1005_v53  ;;  %1149 = vmatpush.msrb.mxu1 %v1006_v55 }
 0x4ac   :  { %1130 = vmatpush.msrb.mxu0 %v989_v63  ;;  %1150 = vmatpush.msrb.mxu1 %v990_v28 }
 0x4ad   :  { %1246 = vmatmul.msk.f32.vlgmr.msrb.gmra.mxu0 %vm253_vm8, %v1105_v5  ;;  %1247 = vmatmul.msk.f32.vlgmr.msrb.gmra.mxu1 %vm253_vm8, %v1105_v5 }
 0x523   :  { %v1172_v13 = vpop.f32.mrf.mxu2 }
 0x524   :  { %v1173_v61 = vadd.f32 %v1172_v13, %v1110_v7 }
 0x526   :  { %v1197_v27 = vmax.f32 %v1173_v61, 0.0 }
 0x527   :  { %v1192_v36 = vpop.f32.mrf.mxu3 }
 0x528   :  { %v1201_v54 = vadd.f32 %v1277_v29, %v1197_v27  ;;  %v1193_v62 = vadd.f32 %v1192_v36, %v1110_v7 }
 0x52a   :  { %1205 = vst [vmem:[%s2330_s4 + $0x10] sm:$0xff] %v1201_v54  ;;  %v1198_v51 = vmax.f32 %v1193_v62, 0.0  ;;  %v1132_v39 = vpop.f32.mrf.mxu0  ;;  %v1152_v44 = vpop.f32.mrf.mxu1 }
 0x52b   :  { %v1133_v38 = vadd.f32 %v1132_v39, %v1110_v7  ;;  %v1153_v45 = vadd.f32 %v1152_v44, %v1110_v7 }
 0x52c   :  { %v1202_v41 = vadd.f32 %v1278_v18, %v1198_v51 }
 0x52d   :  { %v1195_v34 = vmax.f32 %v1133_v38, 0.0  ;;  %v1196_v58 = vmax.f32 %v1153_v45, 0.0 }
 0x52e   :  { %1206 = vst [vmem:[%s2330_s4 + $0x18] sm:$0xff] %v1202_v41 }
 0x52f   :  { %v1199_v22 = vadd.f32 %v1279_v1, %v1195_v34  ;;  %v1200_v11 = vadd.f32 %v1280_v10, %v1196_v58 }
 0x531   :  { %1203 = vst [vmem:[%s2330_s4] sm:$0xff] %v1199_v22 }
 0x532   :  { %1204 = vst [vmem:[%s2330_s4 + $0x8] sm:$0xff] %v1200_v11 }

</bundles_post_ra>
